<compile_context>
chip_gen: v7x
topology: tpu7x:2x2x1
jax: 0.10.0
libtpu: 0.0.40
codegen_flags: <defaults>
</compile_context>

<pallas_src>
import math
from functools import partial

import jax
import jax.numpy as jnp
from jax.experimental import pallas as pl
from jax.experimental.pallas import tpu as pltpu

# --------------------------------------------------------------------------
# Tunables
# --------------------------------------------------------------------------
VMEM_LIMIT = 48 * 1024 * 1024    # below v7x's 64 MiB physical VMEM, > default scoped limits
M_TILE = 256                     # token-row tile target (sublane axis)
KV_TILE = 256                    # kv tile target for attention
MLP_CHUNK = 512                  # chunk of the 4*D MLP hidden dimension (reduction axis)


def _pick_tile(dim, target, align):
    """Largest t <= target with t % align == 0 and dim % t == 0; else the full dim.

    Guarantees every BlockSpec either uses an aligned tile or spans the full
    array dim (so the (8,128) tiling constraint is always satisfied, including
    for the tiny test config)."""
    if dim <= target:
        return dim
    t = (target // align) * align
    while t >= align:
        if dim % t == 0:
            return t
        t -= align
    return dim


def _cparams(sem):
    return pltpu.CompilerParams(dimension_semantics=sem, vmem_limit_bytes=VMEM_LIMIT)


# --------------------------------------------------------------------------
# Kernels
# --------------------------------------------------------------------------
def ln_linear_kernel(x_ref, g_ref, b_ref, w_ref, bias_ref, o_ref, xln_ref, *, eps):
    """Fused LayerNorm(x) @ W_chunk + b_chunk  (used for LN1 + QKV projection).

    Grid = (row tiles, output chunks). The LN result is computed once per row
    tile (chunk index 0) in f32, cached in a bf16 VMEM scratch, and reused as
    the MXU operand for every output chunk."""
    n = pl.program_id(1)

    @pl.when(n == 0)
    def _():
        x = x_ref[...].astype(jnp.float32)
        mu = jnp.mean(x, axis=-1, keepdims=True)
        xc = x - mu
        var = jnp.mean(xc * xc, axis=-1, keepdims=True)
        y = xc * jax.lax.rsqrt(var + eps)
        y = y * g_ref[...].astype(jnp.float32) + b_ref[...].astype(jnp.float32)
        xln_ref[...] = y.astype(xln_ref.dtype)          # bf16 MXU operand, f32 statistics

    h = jnp.dot(xln_ref[...], w_ref[0], preferred_element_type=jnp.float32)
    h = h + bias_ref[0].astype(jnp.float32)
    o_ref[0] = h.astype(o_ref.dtype)


def attn_outproj_kernel(q_ref, k_ref, v_ref, w_ref, b_ref, res_ref, o_ref,
                        m_ref, l_ref, acc_ref, oacc_ref, *, scale):
    """Flash attention (online softmax) fused with the out-projection + bias +
    residual.  Grid = (batch, q-tile, head, kv-tile); the head axis is an
    in-kernel reduction into a lane-dense (tq, D) f32 accumulator."""
    hi = pl.program_id(2)
    ki = pl.program_id(3)
    nh = pl.num_programs(2)
    nk = pl.num_programs(3)

    @pl.when((hi == 0) & (ki == 0))
    def _():
        oacc_ref[...] = jnp.zeros_like(oacc_ref)

    @pl.when(ki == 0)
    def _():
        m_ref[...] = jnp.full_like(m_ref, -jnp.inf)
        l_ref[...] = jnp.zeros_like(l_ref)
        acc_ref[...] = jnp.zeros_like(acc_ref)

    q = q_ref[0, 0]                                     # (tq, hd)  bf16
    k = k_ref[0, 0]                                     # (tkv, hd) bf16
    v = v_ref[0, 0]                                     # (tkv, hd) bf16
    s = jax.lax.dot_general(q, k, (((1,), (1,)), ((), ())),
                            preferred_element_type=jnp.float32) * scale   # (tq, tkv) f32
    m_prev = m_ref[...]
    m_new = jnp.maximum(m_prev, jnp.max(s, axis=-1, keepdims=True))
    alpha = jnp.exp(m_prev - m_new)
    p = jnp.exp(s - m_new)                              # f32 softmax statistics
    l_ref[...] = alpha * l_ref[...] + jnp.sum(p, axis=-1, keepdims=True)
    acc_ref[...] = alpha * acc_ref[...] + jnp.dot(p.astype(v.dtype), v,
                                                  preferred_element_type=jnp.float32)
    m_ref[...] = m_new

    @pl.when(ki == nk - 1)
    def _():
        inv_l = pl.reciprocal(l_ref[...], approx=True)  # EUP reciprocal, frees the VALU
        attn_h = (acc_ref[...] * inv_l).astype(w_ref.dtype)           # (tq, hd) bf16
        oacc_ref[...] += jnp.dot(attn_h, w_ref[0],
                                 preferred_element_type=jnp.float32)  # out-proj partial

    @pl.when((hi == nh - 1) & (ki == nk - 1))
    def _():
        out = oacc_ref[...] + b_ref[...].astype(jnp.float32) + res_ref[0].astype(jnp.float32)
        o_ref[0] = out.astype(o_ref.dtype)


def ln_mlp_kernel(x_ref, g_ref, b_ref, fcw_ref, fcb_ref, pw_ref, pb_ref, o_ref,
                  xln_ref, acc_ref, *, eps):
    """Fused LN2 -> c_fc -> QuickGELU -> c_proj -> +bias -> +residual.

    Grid = (row tiles, hidden chunks).  The (tm, C) hidden activation lives
    only in registers/VMEM; the LN result is cached once per row tile."""
    c = pl.program_id(1)

    @pl.when(c == 0)
    def _():
        x = x_ref[...].astype(jnp.float32)
        mu = jnp.mean(x, axis=-1, keepdims=True)
        xc = x - mu
        var = jnp.mean(xc * xc, axis=-1, keepdims=True)
        y = xc * jax.lax.rsqrt(var + eps)
        y = y * g_ref[...].astype(jnp.float32) + b_ref[...].astype(jnp.float32)
        xln_ref[...] = y.astype(xln_ref.dtype)
        acc_ref[...] = jnp.zeros_like(acc_ref)

    h = jnp.dot(xln_ref[...], fcw_ref[0], preferred_element_type=jnp.float32)
    h = h + fcb_ref[0].astype(jnp.float32)
    h = h * jax.nn.sigmoid(1.702 * h)                   # QuickGELU, f32 math (v5e-safe)
    acc_ref[...] += jnp.dot(h.astype(pw_ref.dtype), pw_ref[0],
                            preferred_element_type=jnp.float32)

    @pl.when(c == pl.num_programs(1) - 1)
    def _():
        out = acc_ref[...] + pb_ref[...].astype(jnp.float32) + x_ref[...].astype(jnp.float32)
        o_ref[...] = out.astype(o_ref.dtype)


def patch_embed_ln_kernel(p_ref, w_ref, pos_ref, g_ref, b_ref, o_ref, *, eps):
    """conv1 (as patch matmul) + positional-embedding add + ln_pre, fused."""
    h = jnp.dot(p_ref[0].astype(w_ref.dtype), w_ref[...],
                preferred_element_type=jnp.float32)
    h = h + pos_ref[...].astype(jnp.float32)
    mu = jnp.mean(h, axis=-1, keepdims=True)
    hc = h - mu
    var = jnp.mean(hc * hc, axis=-1, keepdims=True)
    y = hc * jax.lax.rsqrt(var + eps) * g_ref[...] + b_ref[...]
    o_ref[0] = y.astype(o_ref.dtype)


def linear_bias_kernel(x_ref, w_ref, b_ref, o_ref):
    h = jnp.dot(x_ref[...].astype(w_ref.dtype), w_ref[...],
                preferred_element_type=jnp.float32) + b_ref[...].astype(jnp.float32)
    o_ref[...] = h.astype(o_ref.dtype)


def final_head_kernel(x_ref, g1_ref, b1_ref, g2_ref, b2_ref, w_ref, o_ref, *, eps1, eps2):
    """prompt_norm (eps1) -> ln_post (eps2) -> @ proj, fused in one kernel."""
    x = x_ref[...].astype(jnp.float32)

    def _ln(v, g, b, eps):
        mu = jnp.mean(v, axis=-1, keepdims=True)
        vc = v - mu
        var = jnp.mean(vc * vc, axis=-1, keepdims=True)
        return vc * jax.lax.rsqrt(var + eps) * g + b

    y = _ln(x, g1_ref[...], b1_ref[...], eps1)
    z = _ln(y, g2_ref[...], b2_ref[...], eps2)
    o_ref[...] = jnp.dot(z.astype(w_ref.dtype), w_ref[...],
                         preferred_element_type=jnp.float32).astype(o_ref.dtype)


def l2norm_kernel(x_ref, o_ref):
    x = x_ref[...].astype(jnp.float32)
    ss = jnp.sum(x * x, axis=-1, keepdims=True)
    o_ref[...] = (x * jax.lax.rsqrt(ss)).astype(o_ref.dtype)


# --------------------------------------------------------------------------
# Wrappers (grid / BlockSpec plumbing)
# --------------------------------------------------------------------------
def pallas_ln_linear(x, gamma, beta, w_chunks, b_chunks, *, eps=1e-5, out_dtype=jnp.bfloat16):
    M, D = x.shape
    nN, _, C = w_chunks.shape
    tm = _pick_tile(M, M_TILE, 8)
    grid = (M // tm, nN)
    return pl.pallas_call(
        partial(ln_linear_kernel, eps=eps),
        out_shape=jax.ShapeDtypeStruct((nN, M, C), out_dtype),
        grid_spec=pltpu.PrefetchScalarGridSpec(
            num_scalar_prefetch=0,
            grid=grid,
            in_specs=[
                pl.BlockSpec((tm, D), lambda m, n: (m, 0)),
                pl.BlockSpec((1, D), lambda m, n: (0, 0)),
                pl.BlockSpec((1, D), lambda m, n: (0, 0)),
                pl.BlockSpec((1, D, C), lambda m, n: (n, 0, 0)),
                pl.BlockSpec((1, 1, C), lambda m, n: (n, 0, 0)),
            ],
            out_specs=pl.BlockSpec((1, tm, C), lambda m, n: (n, m, 0)),
            scratch_shapes=[pltpu.VMEM((tm, D), jnp.bfloat16)],
        ),
        compiler_params=_cparams(("parallel", "arbitrary")),
        cost_estimate=pl.CostEstimate(
            flops=2 * M * D * nN * C, transcendentals=0,
            bytes_accessed=x.size * x.dtype.itemsize + w_chunks.size * 2 + nN * M * C * 2),
    )(x, gamma, beta, w_chunks, b_chunks)


def pallas_attention_outproj(qkv, out_w, out_b, residual, heads, scale, *,
                             out_dtype=jnp.float32):
    # qkv: (3*heads, B, L, hd) — chunk h = Q head h, heads+h = K head h, 2*heads+h = V head h
    _, B, L, hd = qkv.shape
    D = out_w.shape[-1]
    tq = _pick_tile(L, KV_TILE, 8)
    tkv = _pick_tile(L, KV_TILE, 8)
    grid = (B, L // tq, heads, L // tkv)
    return pl.pallas_call(
        partial(attn_outproj_kernel, scale=scale),
        out_shape=jax.ShapeDtypeStruct((B, L, D), out_dtype),
        grid_spec=pltpu.PrefetchScalarGridSpec(
            num_scalar_prefetch=0,
            grid=grid,
            in_specs=[
                pl.BlockSpec((1, 1, tq, hd), lambda b, qi, h, ki: (h, b, qi, 0)),
                pl.BlockSpec((1, 1, tkv, hd), lambda b, qi, h, ki: (heads + h, b, ki, 0)),
                pl.BlockSpec((1, 1, tkv, hd), lambda b, qi, h, ki: (2 * heads + h, b, ki, 0)),
                pl.BlockSpec((1, hd, D), lambda b, qi, h, ki: (h, 0, 0)),
                pl.BlockSpec((1, D), lambda b, qi, h, ki: (0, 0)),
                pl.BlockSpec((1, tq, D), lambda b, qi, h, ki: (b, qi, 0)),
            ],
            out_specs=pl.BlockSpec((1, tq, D), lambda b, qi, h, ki: (b, qi, 0)),
            scratch_shapes=[pltpu.VMEM((tq, 1), jnp.float32),
                            pltpu.VMEM((tq, 1), jnp.float32),
                            pltpu.VMEM((tq, hd), jnp.float32),
                            pltpu.VMEM((tq, D), jnp.float32)],
        ),
        compiler_params=_cparams(("parallel", "parallel", "arbitrary", "arbitrary")),
        cost_estimate=pl.CostEstimate(
            flops=4 * B * heads * L * L * hd + 2 * B * L * heads * hd * D,
            transcendentals=B * heads * L * L,
            bytes_accessed=qkv.size * 2 + out_w.size * 2 + 2 * B * L * D * 4),
    )(qkv, qkv, qkv, out_w, out_b, residual)
    # TODO(synk): for hd < 128 a two-heads-per-tile q/k/v layout would make the score
    # matmuls wider; needs an in-kernel lane split, left as a follow-up.


def pallas_ln_mlp_residual(x, gamma, beta, fc_w, fc_b, proj_w, proj_b, *, eps=1e-5,
                           out_dtype=jnp.float32):
    M, D = x.shape
    nC, _, C = fc_w.shape
    tm = _pick_tile(M, M_TILE, 8)
    grid = (M // tm, nC)
    return pl.pallas_call(
        partial(ln_mlp_kernel, eps=eps),
        out_shape=jax.ShapeDtypeStruct((M, D), out_dtype),
        grid_spec=pltpu.PrefetchScalarGridSpec(
            num_scalar_prefetch=0,
            grid=grid,
            in_specs=[
                pl.BlockSpec((tm, D), lambda m, c: (m, 0)),
                pl.BlockSpec((1, D), lambda m, c: (0, 0)),
                pl.BlockSpec((1, D), lambda m, c: (0, 0)),
                pl.BlockSpec((1, D, C), lambda m, c: (c, 0, 0)),
                pl.BlockSpec((1, 1, C), lambda m, c: (c, 0, 0)),
                pl.BlockSpec((1, C, D), lambda m, c: (c, 0, 0)),
                pl.BlockSpec((1, D), lambda m, c: (0, 0)),
            ],
            out_specs=pl.BlockSpec((tm, D), lambda m, c: (m, 0)),
            scratch_shapes=[pltpu.VMEM((tm, D), jnp.bfloat16),
                            pltpu.VMEM((tm, D), jnp.float32)],
        ),
        compiler_params=_cparams(("parallel", "arbitrary")),
        cost_estimate=pl.CostEstimate(
            flops=4 * M * D * nC * C,
            transcendentals=M * nC * C,
            bytes_accessed=2 * M * D * 4 + (fc_w.size + proj_w.size) * 2),
    )(x, gamma, beta, fc_w, fc_b, proj_w, proj_b)


def pallas_patch_embed_ln(patches, w_t, pos_spatial, gamma, beta, *, eps=1e-5):
    B, HW, K = patches.shape
    D = w_t.shape[-1]
    tp = _pick_tile(HW, M_TILE, 8)
    grid = (B, HW // tp)
    return pl.pallas_call(
        partial(patch_embed_ln_kernel, eps=eps),
        out_shape=jax.ShapeDtypeStruct((B, HW, D), jnp.float32),
        grid_spec=pltpu.PrefetchScalarGridSpec(
            num_scalar_prefetch=0,
            grid=grid,
            in_specs=[pl.BlockSpec((1, tp, K), lambda b, l: (b, l, 0)),
                      pl.BlockSpec((K, D), lambda b, l: (0, 0)),
                      pl.BlockSpec((tp, D), lambda b, l: (l, 0)),
                      pl.BlockSpec((1, D), lambda b, l: (0, 0)),
                      pl.BlockSpec((1, D), lambda b, l: (0, 0))],
            out_specs=pl.BlockSpec((1, tp, D), lambda b, l: (b, l, 0)),
        ),
        compiler_params=_cparams(("parallel", "parallel")),
        cost_estimate=pl.CostEstimate(
            flops=2 * B * HW * K * D, transcendentals=0,
            bytes_accessed=patches.size * 4 + w_t.size * 2 + B * HW * D * 4),
    )(patches, w_t, pos_spatial, gamma, beta)


def pallas_linear(x, w, bias, *, out_dtype=jnp.float32):
    M, K = x.shape
    _, N = w.shape
    tm = _pick_tile(M, M_TILE, 8)
    grid = (M // tm,)
    return pl.pallas_call(
        linear_bias_kernel,
        out_shape=jax.ShapeDtypeStruct((M, N), out_dtype),
        grid_spec=pltpu.PrefetchScalarGridSpec(
            num_scalar_prefetch=0,
            grid=grid,
            in_specs=[pl.BlockSpec((tm, K), lambda m: (m, 0)),
                      pl.BlockSpec((K, N), lambda m: (0, 0)),
                      pl.BlockSpec((1, N), lambda m: (0, 0))],
            out_specs=pl.BlockSpec((tm, N), lambda m: (m, 0)),
        ),
        compiler_params=_cparams(("parallel",)),
    )(x, w, bias)


def pallas_final_head(x, g1, b1, g2, b2, proj, *, eps1=1e-6, eps2=1e-5):
    M, D = x.shape
    _, od = proj.shape
    tm = _pick_tile(M, M_TILE, 8)
    grid = (M // tm,)
    return pl.pallas_call(
        partial(final_head_kernel, eps1=eps1, eps2=eps2),
        out_shape=jax.ShapeDtypeStruct((M, od), jnp.float32),
        grid_spec=pltpu.PrefetchScalarGridSpec(
            num_scalar_prefetch=0,
            grid=grid,
            in_specs=[pl.BlockSpec((tm, D), lambda m: (m, 0)),
                      pl.BlockSpec((1, D), lambda m: (0, 0)),
                      pl.BlockSpec((1, D), lambda m: (0, 0)),
                      pl.BlockSpec((1, D), lambda m: (0, 0)),
                      pl.BlockSpec((1, D), lambda m: (0, 0)),
                      pl.BlockSpec((D, od), lambda m: (0, 0))],
            out_specs=pl.BlockSpec((tm, od), lambda m: (m, 0)),
        ),
        compiler_params=_cparams(("parallel",)),
    )(x, g1, b1, g2, b2, proj)


def pallas_l2norm(x):
    M, C = x.shape
    tm = _pick_tile(M, 512, 8)
    grid = (M // tm,)
    return pl.pallas_call(
        l2norm_kernel,
        out_shape=jax.ShapeDtypeStruct((M, C), jnp.float32),
        grid_spec=pltpu.PrefetchScalarGridSpec(
            num_scalar_prefetch=0,
            grid=grid,
            in_specs=[pl.BlockSpec((tm, C), lambda m: (m, 0))],
            out_specs=pl.BlockSpec((tm, C), lambda m: (m, 0)),
        ),
        compiler_params=_cparams(("parallel",)),
    )(x)


# --------------------------------------------------------------------------
# Transformer residual block (CLIP ResidualAttentionBlock, eval mode)
# --------------------------------------------------------------------------
def resblock(x, p, heads):
    B, L, D = x.shape
    hd = D // heads
    M = B * L
    x2 = x.reshape(M, D)

    # (1) LN1 + QKV projection, emitted directly in per-head-chunk layout (3*heads, M, hd)
    qkv = pallas_ln_linear(x2, p["ln1_g"], p["ln1_b"], p["qkv_w"], p["qkv_b"],
                           eps=1e-5, out_dtype=jnp.bfloat16)
    qkv = qkv.reshape(3 * heads, B, L, hd)              # free reshape, no transpose

    # (2) flash attention + out-proj + bias + residual, one kernel (drop_path = identity)
    x_attn = pallas_attention_outproj(qkv, p["out_w"], p["out_b"], x,
                                      heads, 1.0 / math.sqrt(hd))       # (B, L, D) f32

    # (3) LN2 + c_fc + QuickGELU + c_proj + bias + residual, one kernel
    out = pallas_ln_mlp_residual(x_attn.reshape(M, D), p["ln2_g"], p["ln2_b"],
                                 p["fc_w"], p["fc_b"], p["proj_w"], p["proj_b"])
    return out.reshape(B, L, D)


# --------------------------------------------------------------------------
# Full forward pass
# --------------------------------------------------------------------------
def vpt_clip_forward(x, params, cfg):
    B = x.shape[0]
    ps = cfg["patch_size"]
    D = cfg["width"]
    R = cfg["input_resolution"]
    assert R % ps == 0
    H = W = R // ps            # == spatial_size -> bilinear pos-embed resize is the identity
    HW = H * W
    nt = cfg["num_tokens"]
    od = cfg["output_dim"]
    heads = cfg["heads"]

    # ---- conv1 (stride == kernel == patch, no bias) + pos add + ln_pre, fused ----
    patches = (x.reshape(B, 3, H, ps, W, ps)
                 .transpose(0, 2, 4, 1, 3, 5)
                 .reshape(B, HW, 3 * ps * ps))
    pos = params["positional_embedding"]
    patches_ln = pallas_patch_embed_ln(patches, params["conv1_w_t"], pos[1:],
                                       params["ln_pre_g"], params["ln_pre_b"], eps=1e-5)

    # ---- class-token row: cls + (pos[0] + cls) -> ln_pre; single D-vector, plain jnp ----
    cls = params["class_embedding"]
    cls_row = (2.0 * cls + pos[0]).astype(jnp.float32)
    mu = jnp.mean(cls_row)
    var = jnp.mean((cls_row - mu) ** 2)
    cls_ln = ((cls_row - mu) * jax.lax.rsqrt(var + 1e-5)
              * params["ln_pre_g"][0] + params["ln_pre_b"][0])
    cls_ln = jnp.broadcast_to(cls_ln[None, None, :], (B, 1, D))

    # ---- project ALL prompts (shallow + deep) once, hoisted out of the layer loop ----
    proj_prompts = pallas_linear(params["all_prompts"], params["prompt_proj_w_t"],
                                 params["prompt_proj_b"]).reshape(-1, nt, D)

    shallow = jnp.broadcast_to(proj_prompts[0][None], (B, nt, D))
    h = jnp.concatenate([cls_ln, shallow, patches_ln], axis=1)           # (B, L, D)
    L = 1 + nt + HW

    features = []
    for i in range(cfg["layers"]):
        if i == 0:
            h = resblock(h, params["blocks"][i], heads)
        elif i <= cfg["total_d_layer"]:
            dp = jnp.broadcast_to(proj_prompts[i][None], (B, nt, D)).astype(h.dtype)
            h = jax.lax.dynamic_update_slice(h, dp, (0, 1, 0))           # replace prompt rows
            h = resblock(h, params["blocks"][i], heads)
        # NOTE: blocks with i > total_d_layer are intentionally skipped — this mirrors
        # forward_deep_prompt() of the reference module exactly (spec quirk kept).
        if len(cfg["out_indices"]) > 1 and i in cfg["out_indices"][:-1]:
            sp = h[:, -HW:, :].reshape(B * HW, D)
            spn = pallas_l2norm(sp).reshape(B, HW, D)
            features.append(spn.transpose(0, 2, 1).reshape(B, D, H, W))

    # ---- prompt_norm (eps 1e-6) -> ln_post (eps 1e-5) -> projection, fused in one kernel ----
    xproj = pallas_final_head(h.reshape(B * L, D),
                              params["prompt_norm_g"], params["prompt_norm_b"],
                              params["ln_post_g"], params["ln_post_b"],
                              params["proj"]).reshape(B, L, od)
    vis = xproj[:, -HW:, :].reshape(B * HW, od)
    visn = pallas_l2norm(vis).reshape(B, HW, od).transpose(0, 2, 1).reshape(B, od, H, W)
    features.append(visn)
    # global-embedding normalization is dead code in the reference forward (returns outs[0]);
    # dropped here to save a kernel launch.
    return tuple(features)


# --------------------------------------------------------------------------
# Parameter preparation: one-time transpose / head-chunking / bf16 cast
# --------------------------------------------------------------------------
def prepare_params(raw, cfg):
    D = cfg["width"]
    heads = cfg["heads"]
    hd = D // heads
    ps = cfg["patch_size"]
    pd = cfg["prompt_dim"]
    dff = 4 * D
    C = _pick_tile(dff, MLP_CHUNK, 128)
    nC = dff // C
    bf = jnp.bfloat16
    # prompt_norm / prompt concat operate on the full width in forward(); requires pd == D
    assert pd == D, "prompt_dim must equal width (as in the reference module's forward path)"

    kp = {
        "conv1_w_t": raw["conv1_w"].reshape(D, 3 * ps * ps).T.astype(bf),   # (3*ps*ps, D)
        "class_embedding": raw["class_embedding"],
        "positional_embedding": raw["positional_embedding"],
        "ln_pre_g": raw["ln_pre_g"].reshape(1, D),
        "ln_pre_b": raw["ln_pre_b"].reshape(1, D),
        "ln_post_g": raw["ln_post_g"].reshape(1, D),
        "ln_post_b": raw["ln_post_b"].reshape(1, D),
        "prompt_norm_g": raw["prompt_norm_g"].reshape(1, D),
        "prompt_norm_b": raw["prompt_norm_b"].reshape(1, D),
        "proj": raw["proj"].astype(bf),
        "prompt_proj_w_t": raw["prompt_proj_w"].T.astype(bf),
        "prompt_proj_b": raw["prompt_proj_b"].reshape(1, pd),
        "all_prompts": jnp.concatenate(
            [raw["prompt_embeddings"][0], raw["deep_prompt_embeddings"].reshape(-1, pd)],
            axis=0),
    }
    blocks = []
    for b in raw["blocks"]:
        blocks.append({
            "ln1_g": b["ln1_g"].reshape(1, D), "ln1_b": b["ln1_b"].reshape(1, D),
            # (3*heads, D, hd): chunk h = Q head h, heads+h = K head h, 2*heads+h = V head h
            "qkv_w": b["in_proj_w"].T.reshape(D, 3 * heads, hd).transpose(1, 0, 2).astype(bf),
            "qkv_b": b["in_proj_b"].reshape(3 * heads, 1, hd),
            "out_w": b["out_proj_w"].T.reshape(heads, hd, D).astype(bf),    # (heads, hd, D)
            "out_b": b["out_proj_b"].reshape(1, D),
            "ln2_g": b["ln2_g"].reshape(1, D), "ln2_b": b["ln2_b"].reshape(1, D),
            "fc_w": b["c_fc_w"].T.reshape(D, nC, C).transpose(1, 0, 2).astype(bf),  # (nC, D, C)
            "fc_b": b["c_fc_b"].reshape(nC, 1, C),
            "proj_w": b["c_proj_w"].T.reshape(nC, C, D).astype(bf),         # (nC, C, D)
            "proj_b": b["c_proj_b"].reshape(1, D),
        })
    kp["blocks"] = blocks
    return kp


# --------------------------------------------------------------------------
# Deterministic synthetic parameters in PyTorch layout (shapes follow __init__)
# --------------------------------------------------------------------------
def init_params(key, cfg):
    D = cfg["width"]
    ps = cfg["patch_size"]
    od = cfg["output_dim"]
    nt = cfg["num_tokens"]
    pd = cfg["prompt_dim"]
    tdl = cfg["total_d_layer"]
    HW = (cfg["input_resolution"] // ps) ** 2
    scale = D ** -0.5
    keys = iter(jax.random.split(key, 8 + 4 * cfg["layers"]))

    def nrm(shape, s=0.02):
        return s * jax.random.normal(next(keys), shape, jnp.float32)

    val = math.sqrt(6.0 / float(3 * ps * ps + pd))
    params = {
        "conv1_w": nrm((D, 3, ps, ps)),
        "class_embedding": scale * jax.random.normal(next(keys), (D,), jnp.float32),
        "positional_embedding": scale * jax.random.normal(next(keys), (HW + 1, D), jnp.float32),
        "ln_pre_g": jnp.ones((D,), jnp.float32), "ln_pre_b": jnp.zeros((D,), jnp.float32),
        "ln_post_g": jnp.ones((D,), jnp.float32), "ln_post_b": jnp.zeros((D,), jnp.float32),
        "proj": scale * jax.random.normal(next(keys), (D, od), jnp.float32),
        "prompt_embeddings": jax.random.uniform(next(keys), (1, nt, pd), jnp.float32, -val, val),
        "deep_prompt_embeddings": jax.random.uniform(
            next(keys), (max(tdl, 1), nt, pd), jnp.float32, -val, val),
        "prompt_proj_w": nrm((pd, pd), math.sqrt(2.0 / pd)),
        "prompt_proj_b": jnp.zeros((pd,), jnp.float32),
        "prompt_norm_g": jnp.ones((pd,), jnp.float32),
        "prompt_norm_b": jnp.zeros((pd,), jnp.float32),
    }
    blocks = []
    for _ in range(cfg["layers"]):
        blocks.append({
            "ln1_g": jnp.ones((D,), jnp.float32), "ln1_b": jnp.zeros((D,), jnp.float32),
            "in_proj_w": nrm((3 * D, D)), "in_proj_b": jnp.zeros((3 * D,), jnp.float32),
            "out_proj_w": nrm((D, D)), "out_proj_b": jnp.zeros((D,), jnp.float32),
            "ln2_g": jnp.ones((D,), jnp.float32), "ln2_b": jnp.zeros((D,), jnp.float32),
            "c_fc_w": nrm((4 * D, D)), "c_fc_b": jnp.zeros((4 * D,), jnp.float32),
            "c_proj_w": nrm((D, 4 * D)), "c_proj_b": jnp.zeros((D,), jnp.float32),
        })
    params["blocks"] = blocks
    return params


if __name__ == "__main__":
    # Small config consistent with the module's constructor:
    #   input_resolution=32, patch_size=16 -> spatial grid 2x2, HW=4, seq len 1+4+4=9
    cfg = dict(
        input_resolution=32,
        patch_size=16,
        width=32,
        layers=2,
        heads=4,
        output_dim=16,
        out_indices=[0, 1],
        num_tokens=4,
        prompt_dim=32,
        total_d_layer=1,
    )
    key = jax.random.PRNGKey(0)
    kx, kparam = jax.random.split(key)
    x = jax.random.normal(
        kx, (2, 3, cfg["input_resolution"], cfg["input_resolution"]), jnp.float32)  # NCHW

    raw = init_params(kparam, cfg)
    params = prepare_params(raw, cfg)          # one-time weight transposing / bf16 cast

    fwd = jax.jit(partial(vpt_clip_forward, cfg=cfg))
    outs = fwd(x, params)                      # tuple of NCHW feature maps
    for o in outs:
        jax.block_until_ready(o)
    assert outs[0].shape == (2, cfg["width"], 2, 2)
    assert outs[-1].shape == (2, cfg["output_dim"], 2, 2)
    print("KERNEL_OK")
</pallas_src>

<mosaic_0001>
module attributes {stable_mosaic.version = 11 : i64} {
  func.func @patch_embed_ln_kernel(%arg0: i32, %arg1: i32, %arg2: memref<1x4x768xf32, #tpu.memory_space<vmem>>, %arg3: memref<768x32xbf16, #tpu.memory_space<vmem>>, %arg4: memref<4x32xf32, #tpu.memory_space<vmem>>, %arg5: memref<1x32xf32, #tpu.memory_space<vmem>>, %arg6: memref<1x32xf32, #tpu.memory_space<vmem>>, %arg7: memref<1x4x32xf32, #tpu.memory_space<vmem>>) attributes {dimension_semantics = [#tpu.dimension_semantics<parallel>, #tpu.dimension_semantics<parallel>], iteration_bounds = array<i64: 2, 1>, scalar_prefetch = 0 : i64, scratch_operands = 0 : i64, tpu.core_type = #tpu.core_type<tc>, window_params = [{transform_indices = @transform_0, window_bounds = array<i64: 1, 4, 768>}, {pipeline_mode = #tpu.pipeline_mode<synchronous>, transform_indices = @transform_1, window_bounds = array<i64: 768, 32>}, {transform_indices = @transform_2, window_bounds = array<i64: 4, 32>}, {pipeline_mode = #tpu.pipeline_mode<synchronous>, transform_indices = @transform_3, window_bounds = array<i64: 1, 32>}, {pipeline_mode = #tpu.pipeline_mode<synchronous>, transform_indices = @transform_4, window_bounds = array<i64: 1, 32>}, {transform_indices = @transform_5, window_bounds = array<i64: 1, 4, 32>}]} {
    %c0 = arith.constant 0 : index
    %c0_0 = arith.constant 0 : index
    %c0_1 = arith.constant 0 : index
    %0 = vector.load %arg2[%c0, %c0_0, %c0_1] : memref<1x4x768xf32, #tpu.memory_space<vmem>>, vector<1x4x768xf32>
    %1 = vector.shape_cast %0 : vector<1x4x768xf32> to vector<4x768xf32>
    %2 = arith.truncf %1 : vector<4x768xf32> to vector<4x768xbf16>
    %c0_2 = arith.constant 0 : index
    %c0_3 = arith.constant 0 : index
    %3 = vector.load %arg3[%c0_2, %c0_3] : memref<768x32xbf16, #tpu.memory_space<vmem>>, vector<768x32xbf16>
    %cst = arith.constant dense<0.000000e+00> : vector<4x32xf32>
    %4 = tpu.matmul %2, %3, %cst {dimension_numbers = #tpu.dot_dimension_numbers<[1], [0], [0], [1], [0, 0, 1, 1], [], []>} : vector<4x768xbf16>, vector<768x32xbf16>, vector<4x32xf32> -> vector<4x32xf32>
    %c0_4 = arith.constant 0 : index
    %c0_5 = arith.constant 0 : index
    %5 = vector.load %arg4[%c0_4, %c0_5] : memref<4x32xf32, #tpu.memory_space<vmem>>, vector<4x32xf32>
    %6 = arith.addf %4, %5 : vector<4x32xf32>
    %cst_6 = arith.constant dense<0.000000e+00> : vector<4xf32>
    %7 = vector.multi_reduction <add>, %6, %cst_6 [1] : vector<4x32xf32> to vector<4xf32>
    %8 = vector.shape_cast %7 : vector<4xf32> to vector<4x1xf32>
    %cst_7 = arith.constant 3.200000e+01 : f32
    %9 = vector.broadcast %cst_7 : f32 to vector<4x1xf32>
    %10 = arith.divf %8, %9 : vector<4x1xf32>
    %11 = vector.broadcast %10 : vector<4x1xf32> to vector<4x32xf32>
    %12 = arith.subf %6, %11 : vector<4x32xf32>
    %13 = arith.mulf %12, %12 : vector<4x32xf32>
    %cst_8 = arith.constant dense<0.000000e+00> : vector<4xf32>
    %14 = vector.multi_reduction <add>, %13, %cst_8 [1] : vector<4x32xf32> to vector<4xf32>
    %15 = vector.shape_cast %14 : vector<4xf32> to vector<4x1xf32>
    %cst_9 = arith.constant 3.200000e+01 : f32
    %16 = vector.broadcast %cst_9 : f32 to vector<4x1xf32>
    %17 = arith.divf %15, %16 : vector<4x1xf32>
    %cst_10 = arith.constant 9.99999974E-6 : f32
    %18 = vector.broadcast %cst_10 : f32 to vector<4x1xf32>
    %19 = arith.addf %17, %18 : vector<4x1xf32>
    %20 = math.rsqrt %19 : vector<4x1xf32>
    %21 = vector.broadcast %20 : vector<4x1xf32> to vector<4x32xf32>
    %22 = arith.mulf %12, %21 : vector<4x32xf32>
    %c0_11 = arith.constant 0 : index
    %c0_12 = arith.constant 0 : index
    %23 = vector.load %arg5[%c0_11, %c0_12] : memref<1x32xf32, #tpu.memory_space<vmem>>, vector<1x32xf32>
    %24 = vector.broadcast %23 : vector<1x32xf32> to vector<4x32xf32>
    %25 = arith.mulf %22, %24 : vector<4x32xf32>
    %c0_13 = arith.constant 0 : index
    %c0_14 = arith.constant 0 : index
    %26 = vector.load %arg6[%c0_13, %c0_14] : memref<1x32xf32, #tpu.memory_space<vmem>>, vector<1x32xf32>
    %27 = vector.broadcast %26 : vector<1x32xf32> to vector<4x32xf32>
    %28 = arith.addf %25, %27 : vector<4x32xf32>
    %c0_15 = arith.constant 0 : index
    %c0_16 = arith.constant 0 : index
    %c0_17 = arith.constant 0 : index
    %29 = vector.load %arg7[%c0_15, %c0_16, %c0_17] : memref<1x4x32xf32, #tpu.memory_space<vmem>>, vector<1x4x32xf32>
    %30 = vector.shape_cast %29 : vector<1x4x32xf32> to vector<4x32xf32>
    %31 = vector.shape_cast %28 : vector<4x32xf32> to vector<1x4x32xf32>
    tpu.vector_store %arg7[%c0_15, %c0_16, %c0_17], %31 {strides = array<i32>} : memref<1x4x32xf32, #tpu.memory_space<vmem>>, vector<1x4x32xf32>,
    return
  }
  func.func @transform_0(%arg0: i32, %arg1: i32) -> (i32, i32, i32) {
    %c0_i32 = arith.constant 0 : i32
    %c0_i32_0 = arith.constant 0 : i32
    return %arg0, %arg1, %c0_i32 : i32, i32, i32
  }
  func.func @transform_1(%arg0: i32, %arg1: i32) -> (i32, i32) {
    %c0_i32 = arith.constant 0 : i32
    %c0_i32_0 = arith.constant 0 : i32
    %c0_i32_1 = arith.constant 0 : i32
    return %c0_i32, %c0_i32_0 : i32, i32
  }
  func.func @transform_2(%arg0: i32, %arg1: i32) -> (i32, i32) {
    %c0_i32 = arith.constant 0 : i32
    %c0_i32_0 = arith.constant 0 : i32
    return %arg1, %c0_i32 : i32, i32
  }
  func.func @transform_3(%arg0: i32, %arg1: i32) -> (i32, i32) {
    %c0_i32 = arith.constant 0 : i32
    %c0_i32_0 = arith.constant 0 : i32
    %c0_i32_1 = arith.constant 0 : i32
    return %c0_i32, %c0_i32_0 : i32, i32
  }
  func.func @transform_4(%arg0: i32, %arg1: i32) -> (i32, i32) {
    %c0_i32 = arith.constant 0 : i32
    %c0_i32_0 = arith.constant 0 : i32
    %c0_i32_1 = arith.constant 0 : i32
    return %c0_i32, %c0_i32_0 : i32, i32
  }
  func.func @transform_5(%arg0: i32, %arg1: i32) -> (i32, i32, i32) {
    %c0_i32 = arith.constant 0 : i32
    %c0_i32_0 = arith.constant 0 : i32
    return %arg0, %arg1, %c0_i32 : i32, i32, i32
  }
}

module attributes {stable_mosaic.version = 11 : i64} {
  func.func @linear_bias_kernel(%arg0: i32, %arg1: memref<8x32xf32, #tpu.memory_space<vmem>>, %arg2: memref<32x32xbf16, #tpu.memory_space<vmem>>, %arg3: memref<1x32xf32, #tpu.memory_space<vmem>>, %arg4: memref<8x32xf32, #tpu.memory_space<vmem>>) attributes {dimension_semantics = [#tpu.dimension_semantics<parallel>], iteration_bounds = array<i64: 1>, scalar_prefetch = 0 : i64, scratch_operands = 0 : i64, tpu.core_type = #tpu.core_type<tc>, window_params = [{transform_indices = @transform_0, window_bounds = array<i64: 8, 32>}, {pipeline_mode = #tpu.pipeline_mode<synchronous>, transform_indices = @transform_1, window_bounds = array<i64: 32, 32>}, {pipeline_mode = #tpu.pipeline_mode<synchronous>, transform_indices = @transform_2, window_bounds = array<i64: 1, 32>}, {transform_indices = @transform_3, window_bounds = array<i64: 8, 32>}]} {
    %c0 = arith.constant 0 : index
    %c0_0 = arith.constant 0 : index
    %0 = vector.load %arg1[%c0, %c0_0] : memref<8x32xf32, #tpu.memory_space<vmem>>, vector<8x32xf32>
    %1 = arith.truncf %0 : vector<8x32xf32> to vector<8x32xbf16>
    %c0_1 = arith.constant 0 : index
    %c0_2 = arith.constant 0 : index
    %2 = vector.load %arg2[%c0_1, %c0_2] : memref<32x32xbf16, #tpu.memory_space<vmem>>, vector<32x32xbf16>
    %cst = arith.constant dense<0.000000e+00> : vector<8x32xf32>
    %3 = tpu.matmul %1, %2, %cst {dimension_numbers = #tpu.dot_dimension_numbers<[1], [0], [0], [1], [0, 0, 1, 1], [], []>} : vector<8x32xbf16>, vector<32x32xbf16>, vector<8x32xf32> -> vector<8x32xf32>
    %c0_3 = arith.constant 0 : index
    %c0_4 = arith.constant 0 : index
    %4 = vector.load %arg3[%c0_3, %c0_4] : memref<1x32xf32, #tpu.memory_space<vmem>>, vector<1x32xf32>
    %5 = vector.broadcast %4 : vector<1x32xf32> to vector<8x32xf32>
    %6 = arith.addf %3, %5 : vector<8x32xf32>
    %c0_5 = arith.constant 0 : index
    %c0_6 = arith.constant 0 : index
    %7 = vector.load %arg4[%c0_5, %c0_6] : memref<8x32xf32, #tpu.memory_space<vmem>>, vector<8x32xf32>
    tpu.vector_store %arg4[%c0_5, %c0_6], %6 {strides = array<i32>} : memref<8x32xf32, #tpu.memory_space<vmem>>, vector<8x32xf32>,
    return
  }
  func.func @transform_0(%arg0: i32) -> (i32, i32) {
    %c0_i32 = arith.constant 0 : i32
    %c0_i32_0 = arith.constant 0 : i32
    return %arg0, %c0_i32 : i32, i32
  }
  func.func @transform_1(%arg0: i32) -> (i32, i32) {
    %c0_i32 = arith.constant 0 : i32
    %c0_i32_0 = arith.constant 0 : i32
    %c0_i32_1 = arith.constant 0 : i32
    return %c0_i32, %c0_i32_0 : i32, i32
  }
  func.func @transform_2(%arg0: i32) -> (i32, i32) {
    %c0_i32 = arith.constant 0 : i32
    %c0_i32_0 = arith.constant 0 : i32
    %c0_i32_1 = arith.constant 0 : i32
    return %c0_i32, %c0_i32_0 : i32, i32
  }
  func.func @transform_3(%arg0: i32) -> (i32, i32) {
    %c0_i32 = arith.constant 0 : i32
    %c0_i32_0 = arith.constant 0 : i32
    return %arg0, %c0_i32 : i32, i32
  }
}

module attributes {stable_mosaic.version = 11 : i64} {
  func.func @ln_linear_kernel(%arg0: i32, %arg1: i32, %arg2: memref<18x32xf32, #tpu.memory_space<vmem>>, %arg3: memref<1x32xf32, #tpu.memory_space<vmem>>, %arg4: memref<1x32xf32, #tpu.memory_space<vmem>>, %arg5: memref<1x32x8xbf16, #tpu.memory_space<vmem>>, %arg6: memref<1x1x8xf32, #tpu.memory_space<vmem>>, %arg7: memref<1x18x8xbf16, #tpu.memory_space<vmem>>, %arg8: memref<18x32xbf16, #tpu.memory_space<vmem>>) attributes {dimension_semantics = [#tpu.dimension_semantics<parallel>, #tpu.dimension_semantics<arbitrary>], iteration_bounds = array<i64: 1, 12>, scalar_prefetch = 0 : i64, scratch_operands = 1 : i64, tpu.core_type = #tpu.core_type<tc>, window_params = [{transform_indices = @transform_0, window_bounds = array<i64: 18, 32>}, {pipeline_mode = #tpu.pipeline_mode<synchronous>, transform_indices = @transform_1, window_bounds = array<i64: 1, 32>}, {pipeline_mode = #tpu.pipeline_mode<synchronous>, transform_indices = @transform_2, window_bounds = array<i64: 1, 32>}, {transform_indices = @transform_3, window_bounds = array<i64: 1, 32, 8>}, {transform_indices = @transform_4, window_bounds = array<i64: 1, 1, 8>}, {transform_indices = @transform_5, window_bounds = array<i64: 1, 18, 8>}]} {
    %c0_i32 = arith.constant 0 : i32
    %0 = arith.cmpi eq, %arg1, %c0_i32 : i32
    %1 = arith.extui %0 : i1 to i32
    %c0_i32_0 = arith.constant 0 : i32
    %2 = arith.cmpi ne, %1, %c0_i32_0 : i32
    scf.if %2 {
      %c0_11 = arith.constant 0 : index
      %c0_12 = arith.constant 0 : index
      %15 = vector.load %arg2[%c0_11, %c0_12] : memref<18x32xf32, #tpu.memory_space<vmem>>, vector<18x32xf32>
      %cst_13 = arith.constant dense<0.000000e+00> : vector<18xf32>
      %16 = vector.multi_reduction <add>, %15, %cst_13 [1] : vector<18x32xf32> to vector<18xf32>
      %17 = vector.shape_cast %16 : vector<18xf32> to vector<18x1xf32>
      %cst_14 = arith.constant 3.200000e+01 : f32
      %18 = vector.broadcast %cst_14 : f32 to vector<18x1xf32>
      %19 = arith.divf %17, %18 : vector<18x1xf32>
      %20 = vector.broadcast %19 : vector<18x1xf32> to vector<18x32xf32>
      %21 = arith.subf %15, %20 : vector<18x32xf32>
      %22 = arith.mulf %21, %21 : vector<18x32xf32>
      %cst_15 = arith.constant dense<0.000000e+00> : vector<18xf32>
      %23 = vector.multi_reduction <add>, %22, %cst_15 [1] : vector<18x32xf32> to vector<18xf32>
      %24 = vector.shape_cast %23 : vector<18xf32> to vector<18x1xf32>
      %cst_16 = arith.constant 3.200000e+01 : f32
      %25 = vector.broadcast %cst_16 : f32 to vector<18x1xf32>
      %26 = arith.divf %24, %25 : vector<18x1xf32>
      %cst_17 = arith.constant 9.99999974E-6 : f32
      %27 = vector.broadcast %cst_17 : f32 to vector<18x1xf32>
      %28 = arith.addf %26, %27 : vector<18x1xf32>
      %29 = math.rsqrt %28 : vector<18x1xf32>
      %30 = vector.broadcast %29 : vector<18x1xf32> to vector<18x32xf32>
      %31 = arith.mulf %21, %30 : vector<18x32xf32>
      %c0_18 = arith.constant 0 : index
      %c0_19 = arith.constant 0 : index
      %32 = vector.load %arg3[%c0_18, %c0_19] : memref<1x32xf32, #tpu.memory_space<vmem>>, vector<1x32xf32>
      %33 = vector.broadcast %32 : vector<1x32xf32> to vector<18x32xf32>
      %34 = arith.mulf %31, %33 : vector<18x32xf32>
      %c0_20 = arith.constant 0 : index
      %c0_21 = arith.constant 0 : index
      %35 = vector.load %arg4[%c0_20, %c0_21] : memref<1x32xf32, #tpu.memory_space<vmem>>, vector<1x32xf32>
      %36 = vector.broadcast %35 : vector<1x32xf32> to vector<18x32xf32>
      %37 = arith.addf %34, %36 : vector<18x32xf32>
      %38 = arith.truncf %37 : vector<18x32xf32> to vector<18x32xbf16>
      %c0_22 = arith.constant 0 : index
      %c0_23 = arith.constant 0 : index
      %39 = vector.load %arg8[%c0_22, %c0_23] : memref<18x32xbf16, #tpu.memory_space<vmem>>, vector<18x32xbf16>
      tpu.vector_store %arg8[%c0_22, %c0_23], %38 {strides = array<i32>} : memref<18x32xbf16, #tpu.memory_space<vmem>>, vector<18x32xbf16>,
    } else {
    }
    %c0 = arith.constant 0 : index
    %c0_1 = arith.constant 0 : index
    %3 = vector.load %arg8[%c0, %c0_1] : memref<18x32xbf16, #tpu.memory_space<vmem>>, vector<18x32xbf16>
    %c0_2 = arith.constant 0 : index
    %c0_3 = arith.constant 0 : index
    %c0_4 = arith.constant 0 : index
    %4 = vector.load %arg5[%c0_2, %c0_3, %c0_4] : memref<1x32x8xbf16, #tpu.memory_space<vmem>>, vector<1x32x8xbf16>
    %5 = vector.shape_cast %4 : vector<1x32x8xbf16> to vector<32x8xbf16>
    %cst = arith.constant dense<0.000000e+00> : vector<18x8xf32>
    %6 = tpu.matmul %3, %5, %cst {dimension_numbers = #tpu.dot_dimension_numbers<[1], [0], [0], [1], [0, 0, 1, 1], [], []>} : vector<18x32xbf16>, vector<32x8xbf16>, vector<18x8xf32> -> vector<18x8xf32>
    %c0_5 = arith.constant 0 : index
    %c0_6 = arith.constant 0 : index
    %c0_7 = arith.constant 0 : index
    %7 = vector.load %arg6[%c0_5, %c0_6, %c0_7] : memref<1x1x8xf32, #tpu.memory_space<vmem>>, vector<1x1x8xf32>
    %8 = vector.shape_cast %7 : vector<1x1x8xf32> to vector<1x8xf32>
    %9 = vector.broadcast %8 : vector<1x8xf32> to vector<18x8xf32>
    %10 = arith.addf %6, %9 : vector<18x8xf32>
    %11 = arith.truncf %10 : vector<18x8xf32> to vector<18x8xbf16>
    %c0_8 = arith.constant 0 : index
    %c0_9 = arith.constant 0 : index
    %c0_10 = arith.constant 0 : index
    %12 = vector.load %arg7[%c0_8, %c0_9, %c0_10] : memref<1x18x8xbf16, #tpu.memory_space<vmem>>, vector<1x18x8xbf16>
    %13 = vector.shape_cast %12 : vector<1x18x8xbf16> to vector<18x8xbf16>
    %14 = vector.shape_cast %11 : vector<18x8xbf16> to vector<1x18x8xbf16>
    tpu.vector_store %arg7[%c0_8, %c0_9, %c0_10], %14 {strides = array<i32>} : memref<1x18x8xbf16, #tpu.memory_space<vmem>>, vector<1x18x8xbf16>,
    return
  }
  func.func @transform_0(%arg0: i32, %arg1: i32) -> (i32, i32) {
    %c0_i32 = arith.constant 0 : i32
    %c0_i32_0 = arith.constant 0 : i32
    return %arg0, %c0_i32 : i32, i32
  }
  func.func @transform_1(%arg0: i32, %arg1: i32) -> (i32, i32) {
    %c0_i32 = arith.constant 0 : i32
    %c0_i32_0 = arith.constant 0 : i32
    %c0_i32_1 = arith.constant 0 : i32
    return %c0_i32, %c0_i32_0 : i32, i32
  }
  func.func @transform_2(%arg0: i32, %arg1: i32) -> (i32, i32) {
    %c0_i32 = arith.constant 0 : i32
    %c0_i32_0 = arith.constant 0 : i32
    %c0_i32_1 = arith.constant 0 : i32
    return %c0_i32, %c0_i32_0 : i32, i32
  }
  func.func @transform_3(%arg0: i32, %arg1: i32) -> (i32, i32, i32) {
    %c0_i32 = arith.constant 0 : i32
    %c0_i32_0 = arith.constant 0 : i32
    %c0_i32_1 = arith.constant 0 : i32
    return %arg1, %c0_i32, %c0_i32_0 : i32, i32, i32
  }
  func.func @transform_4(%arg0: i32, %arg1: i32) -> (i32, i32, i32) {
    %c0_i32 = arith.constant 0 : i32
    %c0_i32_0 = arith.constant 0 : i32
    %c0_i32_1 = arith.constant 0 : i32
    return %arg1, %c0_i32, %c0_i32_0 : i32, i32, i32
  }
  func.func @transform_5(%arg0: i32, %arg1: i32) -> (i32, i32, i32) {
    %c0_i32 = arith.constant 0 : i32
    %c0_i32_0 = arith.constant 0 : i32
    return %arg1, %arg0, %c0_i32 : i32, i32, i32
  }
}

module attributes {stable_mosaic.version = 11 : i64} {
  func.func @attn_outproj_kernel(%arg0: i32, %arg1: i32, %arg2: i32, %arg3: i32, %arg4: memref<1x1x9x8xbf16, #tpu.memory_space<vmem>>, %arg5: memref<1x1x9x8xbf16, #tpu.memory_space<vmem>>, %arg6: memref<1x1x9x8xbf16, #tpu.memory_space<vmem>>, %arg7: memref<1x8x32xbf16, #tpu.memory_space<vmem>>, %arg8: memref<1x32xf32, #tpu.memory_space<vmem>>, %arg9: memref<1x9x32xf32, #tpu.memory_space<vmem>>, %arg10: memref<1x9x32xf32, #tpu.memory_space<vmem>>, %arg11: memref<9x1xf32, #tpu.memory_space<vmem>>, %arg12: memref<9x1xf32, #tpu.memory_space<vmem>>, %arg13: memref<9x8xf32, #tpu.memory_space<vmem>>, %arg14: memref<9x32xf32, #tpu.memory_space<vmem>>) attributes {dimension_semantics = [#tpu.dimension_semantics<parallel>, #tpu.dimension_semantics<parallel>, #tpu.dimension_semantics<arbitrary>, #tpu.dimension_semantics<arbitrary>], iteration_bounds = array<i64: 2, 1, 4, 1>, scalar_prefetch = 0 : i64, scratch_operands = 4 : i64, tpu.core_type = #tpu.core_type<tc>, window_params = [{transform_indices = @transform_0, window_bounds = array<i64: 1, 1, 9, 8>}, {transform_indices = @transform_1, window_bounds = array<i64: 1, 1, 9, 8>}, {transform_indices = @transform_2, window_bounds = array<i64: 1, 1, 9, 8>}, {transform_indices = @transform_3, window_bounds = array<i64: 1, 8, 32>}, {pipeline_mode = #tpu.pipeline_mode<synchronous>, transform_indices = @transform_4, window_bounds = array<i64: 1, 32>}, {transform_indices = @transform_5, window_bounds = array<i64: 1, 9, 32>}, {transform_indices = @transform_6, window_bounds = array<i64: 1, 9, 32>}]} {
    %c0_i32 = arith.constant 0 : i32
    %0 = arith.cmpi eq, %arg2, %c0_i32 : i32
    %c0_i32_0 = arith.constant 0 : i32
    %1 = arith.cmpi eq, %arg3, %c0_i32_0 : i32
    %2 = arith.andi %0, %1 : i1
    %3 = arith.extui %2 : i1 to i32
    %c0_i32_1 = arith.constant 0 : i32
    %4 = arith.cmpi ne, %3, %c0_i32_1 : i32
    scf.if %4 {
      %cst_35 = arith.constant 0.000000e+00 : f32
      %48 = vector.broadcast %cst_35 : f32 to vector<9x32xf32>
      %c0_36 = arith.constant 0 : index
      %c0_37 = arith.constant 0 : index
      %49 = vector.load %arg14[%c0_36, %c0_37] : memref<9x32xf32, #tpu.memory_space<vmem>>, vector<9x32xf32>
      tpu.vector_store %arg14[%c0_36, %c0_37], %48 {strides = array<i32>} : memref<9x32xf32, #tpu.memory_space<vmem>>, vector<9x32xf32>,
    } else {
    }
    %c0_i32_2 = arith.constant 0 : i32
    %5 = arith.cmpi eq, %arg3, %c0_i32_2 : i32
    %6 = arith.extui %5 : i1 to i32
    %c0_i32_3 = arith.constant 0 : i32
    %7 = arith.cmpi ne, %6, %c0_i32_3 : i32
    scf.if %7 {
      %cst_35 = arith.constant 0xFF800000 : f32
      %48 = vector.broadcast %cst_35 : f32 to vector<9x1xf32>
      %c0_36 = arith.constant 0 : index
      %c0_37 = arith.constant 0 : index
      %49 = vector.load %arg11[%c0_36, %c0_37] : memref<9x1xf32, #tpu.memory_space<vmem>>, vector<9x1xf32>
      tpu.vector_store %arg11[%c0_36, %c0_37], %48 {strides = array<i32>} : memref<9x1xf32, #tpu.memory_space<vmem>>, vector<9x1xf32>,
      %cst_38 = arith.constant 0.000000e+00 : f32
      %50 = vector.broadcast %cst_38 : f32 to vector<9x1xf32>
      %c0_39 = arith.constant 0 : index
      %c0_40 = arith.constant 0 : index
      %51 = vector.load %arg12[%c0_39, %c0_40] : memref<9x1xf32, #tpu.memory_space<vmem>>, vector<9x1xf32>
      tpu.vector_store %arg12[%c0_39, %c0_40], %50 {strides = array<i32>} : memref<9x1xf32, #tpu.memory_space<vmem>>, vector<9x1xf32>,
      %cst_41 = arith.constant 0.000000e+00 : f32
      %52 = vector.broadcast %cst_41 : f32 to vector<9x8xf32>
      %c0_42 = arith.constant 0 : index
      %c0_43 = arith.constant 0 : index
      %53 = vector.load %arg13[%c0_42, %c0_43] : memref<9x8xf32, #tpu.memory_space<vmem>>, vector<9x8xf32>
      tpu.vector_store %arg13[%c0_42, %c0_43], %52 {strides = array<i32>} : memref<9x8xf32, #tpu.memory_space<vmem>>, vector<9x8xf32>,
    } else {
    }
    %c0 = arith.constant 0 : index
    %c0_4 = arith.constant 0 : index
    %c0_5 = arith.constant 0 : index
    %c0_6 = arith.constant 0 : index
    %8 = vector.load %arg4[%c0, %c0_4, %c0_5, %c0_6] : memref<1x1x9x8xbf16, #tpu.memory_space<vmem>>, vector<1x1x9x8xbf16>
    %9 = vector.shape_cast %8 : vector<1x1x9x8xbf16> to vector<9x8xbf16>
    %c0_7 = arith.constant 0 : index
    %c0_8 = arith.constant 0 : index
    %c0_9 = arith.constant 0 : index
    %c0_10 = arith.constant 0 : index
    %10 = vector.load %arg5[%c0_7, %c0_8, %c0_9, %c0_10] : memref<1x1x9x8xbf16, #tpu.memory_space<vmem>>, vector<1x1x9x8xbf16>
    %11 = vector.shape_cast %10 : vector<1x1x9x8xbf16> to vector<9x8xbf16>
    %c0_11 = arith.constant 0 : index
    %c0_12 = arith.constant 0 : index
    %c0_13 = arith.constant 0 : index
    %c0_14 = arith.constant 0 : index
    %12 = vector.load %arg6[%c0_11, %c0_12, %c0_13, %c0_14] : memref<1x1x9x8xbf16, #tpu.memory_space<vmem>>, vector<1x1x9x8xbf16>
    %13 = vector.shape_cast %12 : vector<1x1x9x8xbf16> to vector<9x8xbf16>
    %cst = arith.constant dense<0.000000e+00> : vector<9x9xf32>
    %14 = tpu.matmul %9, %11, %cst {dimension_numbers = #tpu.dot_dimension_numbers<[1], [1], [0], [0], [0, 0, 1, 0], [], []>} : vector<9x8xbf16>, vector<9x8xbf16>, vector<9x9xf32> -> vector<9x9xf32>
    %cst_15 = arith.constant 0.353553385 : f32
    %15 = vector.broadcast %cst_15 : f32 to vector<9x9xf32>
    %16 = arith.mulf %14, %15 : vector<9x9xf32>
    %c0_16 = arith.constant 0 : index
    %c0_17 = arith.constant 0 : index
    %17 = vector.load %arg11[%c0_16, %c0_17] : memref<9x1xf32, #tpu.memory_space<vmem>>, vector<9x1xf32>
    %cst_18 = arith.constant dense<0xFF800000> : vector<9xf32>
    %18 = vector.multi_reduction <maximumf>, %16, %cst_18 [1] : vector<9x9xf32> to vector<9xf32>
    %19 = vector.shape_cast %18 : vector<9xf32> to vector<9x1xf32>
    %20 = arith.maximumf %17, %19 : vector<9x1xf32>
    %21 = arith.subf %17, %20 : vector<9x1xf32>
    %22 = math.exp %21 : vector<9x1xf32>
    %23 = vector.broadcast %20 : vector<9x1xf32> to vector<9x9xf32>
    %24 = arith.subf %16, %23 : vector<9x9xf32>
    %25 = math.exp %24 : vector<9x9xf32>
    %c0_19 = arith.constant 0 : index
    %c0_20 = arith.constant 0 : index
    %26 = vector.load %arg12[%c0_19, %c0_20] : memref<9x1xf32, #tpu.memory_space<vmem>>, vector<9x1xf32>
    %27 = arith.mulf %22, %26 : vector<9x1xf32>
    %cst_21 = arith.constant dense<0.000000e+00> : vector<9xf32>
    %28 = vector.multi_reduction <add>, %25, %cst_21 [1] : vector<9x9xf32> to vector<9xf32>
    %29 = vector.shape_cast %28 : vector<9xf32> to vector<9x1xf32>
    %30 = arith.addf %27, %29 : vector<9x1xf32>
    %c0_22 = arith.constant 0 : index
    %c0_23 = arith.constant 0 : index
    %31 = vector.load %arg12[%c0_22, %c0_23] : memref<9x1xf32, #tpu.memory_space<vmem>>, vector<9x1xf32>
    tpu.vector_store %arg12[%c0_22, %c0_23], %30 {strides = array<i32>} : memref<9x1xf32, #tpu.memory_space<vmem>>, vector<9x1xf32>,
    %c0_24 = arith.constant 0 : index
    %c0_25 = arith.constant 0 : index
    %32 = vector.load %arg13[%c0_24, %c0_25] : memref<9x8xf32, #tpu.memory_space<vmem>>, vector<9x8xf32>
    %33 = vector.broadcast %22 : vector<9x1xf32> to vector<9x8xf32>
    %34 = arith.mulf %33, %32 : vector<9x8xf32>
    %35 = arith.truncf %25 : vector<9x9xf32> to vector<9x9xbf16>
    %cst_26 = arith.constant dense<0.000000e+00> : vector<9x8xf32>
    %36 = tpu.matmul %35, %13, %cst_26 {dimension_numbers = #tpu.dot_dimension_numbers<[1], [0], [0], [1], [0, 0, 1, 1], [], []>} : vector<9x9xbf16>, vector<9x8xbf16>, vector<9x8xf32> -> vector<9x8xf32>
    %37 = arith.addf %34, %36 : vector<9x8xf32>
    %c0_27 = arith.constant 0 : index
    %c0_28 = arith.constant 0 : index
    %38 = vector.load %arg13[%c0_27, %c0_28] : memref<9x8xf32, #tpu.memory_space<vmem>>, vector<9x8xf32>
    tpu.vector_store %arg13[%c0_27, %c0_28], %37 {strides = array<i32>} : memref<9x8xf32, #tpu.memory_space<vmem>>, vector<9x8xf32>,
    %c0_29 = arith.constant 0 : index
    %c0_30 = arith.constant 0 : index
    %39 = vector.load %arg11[%c0_29, %c0_30] : memref<9x1xf32, #tpu.memory_space<vmem>>, vector<9x1xf32>
    tpu.vector_store %arg11[%c0_29, %c0_30], %20 {strides = array<i32>} : memref<9x1xf32, #tpu.memory_space<vmem>>, vector<9x1xf32>,
    %c0_i32_31 = arith.constant 0 : i32
    %40 = arith.cmpi eq, %arg3, %c0_i32_31 : i32
    %41 = arith.extui %40 : i1 to i32
    %c0_i32_32 = arith.constant 0 : i32
    %42 = arith.cmpi ne, %41, %c0_i32_32 : i32
    scf.if %42 {
      %c0_35 = arith.constant 0 : index
      %c0_36 = arith.constant 0 : index
      %48 = vector.load %arg12[%c0_35, %c0_36] : memref<9x1xf32, #tpu.memory_space<vmem>>, vector<9x1xf32>
      %49 = tpu.reciprocal %48 {approx = true} : vector<9x1xf32> -> vector<9x1xf32>
      %c0_37 = arith.constant 0 : index
      %c0_38 = arith.constant 0 : index
      %50 = vector.load %arg13[%c0_37, %c0_38] : memref<9x8xf32, #tpu.memory_space<vmem>>, vector<9x8xf32>
      %51 = vector.broadcast %49 : vector<9x1xf32> to vector<9x8xf32>
      %52 = arith.mulf %50, %51 : vector<9x8xf32>
      %53 = arith.truncf %52 : vector<9x8xf32> to vector<9x8xbf16>
      %c0_39 = arith.constant 0 : index
      %c0_40 = arith.constant 0 : index
      %54 = vector.load %arg14[%c0_39, %c0_40] : memref<9x32xf32, #tpu.memory_space<vmem>>, vector<9x32xf32>
      %c0_41 = arith.constant 0 : index
      %c0_42 = arith.constant 0 : index
      %c0_43 = arith.constant 0 : index
      %55 = vector.load %arg7[%c0_41, %c0_42, %c0_43] : memref<1x8x32xbf16, #tpu.memory_space<vmem>>, vector<1x8x32xbf16>
      %56 = vector.shape_cast %55 : vector<1x8x32xbf16> to vector<8x32xbf16>
      %cst_44 = arith.constant dense<0.000000e+00> : vector<9x32xf32>
      %57 = tpu.matmul %53, %56, %cst_44 {dimension_numbers = #tpu.dot_dimension_numbers<[1], [0], [0], [1], [0, 0, 1, 1], [], []>} : vector<9x8xbf16>, vector<8x32xbf16>, vector<9x32xf32> -> vector<9x32xf32>
      %58 = arith.addf %54, %57 : vector<9x32xf32>
      %c0_45 = arith.constant 0 : index
      %c0_46 = arith.constant 0 : index
      %59 = vector.load %arg14[%c0_45, %c0_46] : memref<9x32xf32, #tpu.memory_space<vmem>>, vector<9x32xf32>
      tpu.vector_store %arg14[%c0_45, %c0_46], %58 {strides = array<i32>} : memref<9x32xf32, #tpu.memory_space<vmem>>, vector<9x32xf32>,
    } else {
    }
    %c3_i32 = arith.constant 3 : i32
    %43 = arith.cmpi eq, %arg2, %c3_i32 : i32
    %c0_i32_33 = arith.constant 0 : i32
    %44 = arith.cmpi eq, %arg3, %c0_i32_33 : i32
    %45 = arith.andi %43, %44 : i1
    %46 = arith.extui %45 : i1 to i32
    %c0_i32_34 = arith.constant 0 : i32
    %47 = arith.cmpi ne, %46, %c0_i32_34 : i32
    scf.if %47 {
      %c0_35 = arith.constant 0 : index
      %c0_36 = arith.constant 0 : index
      %48 = vector.load %arg14[%c0_35, %c0_36] : memref<9x32xf32, #tpu.memory_space<vmem>>, vector<9x32xf32>
      %c0_37 = arith.constant 0 : index
      %c0_38 = arith.constant 0 : index
      %49 = vector.load %arg8[%c0_37, %c0_38] : memref<1x32xf32, #tpu.memory_space<vmem>>, vector<1x32xf32>
      %50 = vector.broadcast %49 : vector<1x32xf32> to vector<9x32xf32>
      %51 = arith.addf %48, %50 : vector<9x32xf32>
      %c0_39 = arith.constant 0 : index
      %c0_40 = arith.constant 0 : index
      %c0_41 = arith.constant 0 : index
      %52 = vector.load %arg9[%c0_39, %c0_40, %c0_41] : memref<1x9x32xf32, #tpu.memory_space<vmem>>, vector<1x9x32xf32>
      %53 = vector.shape_cast %52 : vector<1x9x32xf32> to vector<9x32xf32>
      %54 = arith.addf %51, %53 : vector<9x32xf32>
      %c0_42 = arith.constant 0 : index
      %c0_43 = arith.constant 0 : index
      %c0_44 = arith.constant 0 : index
      %55 = vector.load %arg10[%c0_42, %c0_43, %c0_44] : memref<1x9x32xf32, #tpu.memory_space<vmem>>, vector<1x9x32xf32>
      %56 = vector.shape_cast %55 : vector<1x9x32xf32> to vector<9x32xf32>
      %57 = vector.shape_cast %54 : vector<9x32xf32> to vector<1x9x32xf32>
      tpu.vector_store %arg10[%c0_42, %c0_43, %c0_44], %57 {strides = array<i32>} : memref<1x9x32xf32, #tpu.memory_space<vmem>>, vector<1x9x32xf32>,
    } else {
    }
    return
  }
  func.func @transform_0(%arg0: i32, %arg1: i32, %arg2: i32, %arg3: i32) -> (i32, i32, i32, i32) {
    %c0_i32 = arith.constant 0 : i32
    %c0_i32_0 = arith.constant 0 : i32
    return %arg2, %arg0, %arg1, %c0_i32 : i32, i32, i32, i32
  }
  func.func @transform_1(%arg0: i32, %arg1: i32, %arg2: i32, %arg3: i32) -> (i32, i32, i32, i32) {
    %c4_i32 = arith.constant 4 : i32
    %0 = arith.addi %c4_i32, %arg2 : i32
    %c0_i32 = arith.constant 0 : i32
    %c0_i32_0 = arith.constant 0 : i32
    return %0, %arg0, %arg3, %c0_i32 : i32, i32, i32, i32
  }
  func.func @transform_2(%arg0: i32, %arg1: i32, %arg2: i32, %arg3: i32) -> (i32, i32, i32, i32) {
    %c8_i32 = arith.constant 8 : i32
    %0 = arith.addi %c8_i32, %arg2 : i32
    %c0_i32 = arith.constant 0 : i32
    %c0_i32_0 = arith.constant 0 : i32
    return %0, %arg0, %arg3, %c0_i32 : i32, i32, i32, i32
  }
  func.func @transform_3(%arg0: i32, %arg1: i32, %arg2: i32, %arg3: i32) -> (i32, i32, i32) {
    %c0_i32 = arith.constant 0 : i32
    %c0_i32_0 = arith.constant 0 : i32
    %c0_i32_1 = arith.constant 0 : i32
    return %arg2, %c0_i32, %c0_i32_0 : i32, i32, i32
  }
  func.func @transform_4(%arg0: i32, %arg1: i32, %arg2: i32, %arg3: i32) -> (i32, i32) {
    %c0_i32 = arith.constant 0 : i32
    %c0_i32_0 = arith.constant 0 : i32
    %c0_i32_1 = arith.constant 0 : i32
    return %c0_i32, %c0_i32_0 : i32, i32
  }
  func.func @transform_5(%arg0: i32, %arg1: i32, %arg2: i32, %arg3: i32) -> (i32, i32, i32) {
    %c0_i32 = arith.constant 0 : i32
    %c0_i32_0 = arith.constant 0 : i32
    return %arg0, %arg1, %c0_i32 : i32, i32, i32
  }
  func.func @transform_6(%arg0: i32, %arg1: i32, %arg2: i32, %arg3: i32) -> (i32, i32, i32) {
    %c0_i32 = arith.constant 0 : i32
    %c0_i32_0 = arith.constant 0 : i32
    return %arg0, %arg1, %c0_i32 : i32, i32, i32
  }
}

module attributes {stable_mosaic.version = 11 : i64} {
  func.func @ln_mlp_kernel(%arg0: i32, %arg1: i32, %arg2: memref<18x32xf32, #tpu.memory_space<vmem>>, %arg3: memref<1x32xf32, #tpu.memory_space<vmem>>, %arg4: memref<1x32xf32, #tpu.memory_space<vmem>>, %arg5: memref<1x32x128xbf16, #tpu.memory_space<vmem>>, %arg6: memref<1x1x128xf32, #tpu.memory_space<vmem>>, %arg7: memref<1x128x32xbf16, #tpu.memory_space<vmem>>, %arg8: memref<1x32xf32, #tpu.memory_space<vmem>>, %arg9: memref<18x32xf32, #tpu.memory_space<vmem>>, %arg10: memref<18x32xbf16, #tpu.memory_space<vmem>>, %arg11: memref<18x32xf32, #tpu.memory_space<vmem>>) attributes {dimension_semantics = [#tpu.dimension_semantics<parallel>, #tpu.dimension_semantics<arbitrary>], iteration_bounds = array<i64: 1, 1>, scalar_prefetch = 0 : i64, scratch_operands = 2 : i64, tpu.core_type = #tpu.core_type<tc>, window_params = [{transform_indices = @transform_0, window_bounds = array<i64: 18, 32>}, {pipeline_mode = #tpu.pipeline_mode<synchronous>, transform_indices = @transform_1, window_bounds = array<i64: 1, 32>}, {pipeline_mode = #tpu.pipeline_mode<synchronous>, transform_indices = @transform_2, window_bounds = array<i64: 1, 32>}, {transform_indices = @transform_3, window_bounds = array<i64: 1, 32, 128>}, {transform_indices = @transform_4, window_bounds = array<i64: 1, 1, 128>}, {transform_indices = @transform_5, window_bounds = array<i64: 1, 128, 32>}, {pipeline_mode = #tpu.pipeline_mode<synchronous>, transform_indices = @transform_6, window_bounds = array<i64: 1, 32>}, {transform_indices = @transform_7, window_bounds = array<i64: 18, 32>}]} {
    %c0_i32 = arith.constant 0 : i32
    %0 = arith.cmpi eq, %arg1, %c0_i32 : i32
    %1 = arith.extui %0 : i1 to i32
    %c0_i32_0 = arith.constant 0 : i32
    %2 = arith.cmpi ne, %1, %c0_i32_0 : i32
    scf.if %2 {
      %c0_20 = arith.constant 0 : index
      %c0_21 = arith.constant 0 : index
      %29 = vector.load %arg2[%c0_20, %c0_21] : memref<18x32xf32, #tpu.memory_space<vmem>>, vector<18x32xf32>
      %cst_22 = arith.constant dense<0.000000e+00> : vector<18xf32>
      %30 = vector.multi_reduction <add>, %29, %cst_22 [1] : vector<18x32xf32> to vector<18xf32>
      %31 = vector.shape_cast %30 : vector<18xf32> to vector<18x1xf32>
      %cst_23 = arith.constant 3.200000e+01 : f32
      %32 = vector.broadcast %cst_23 : f32 to vector<18x1xf32>
      %33 = arith.divf %31, %32 : vector<18x1xf32>
      %34 = vector.broadcast %33 : vector<18x1xf32> to vector<18x32xf32>
      %35 = arith.subf %29, %34 : vector<18x32xf32>
      %36 = arith.mulf %35, %35 : vector<18x32xf32>
      %cst_24 = arith.constant dense<0.000000e+00> : vector<18xf32>
      %37 = vector.multi_reduction <add>, %36, %cst_24 [1] : vector<18x32xf32> to vector<18xf32>
      %38 = vector.shape_cast %37 : vector<18xf32> to vector<18x1xf32>
      %cst_25 = arith.constant 3.200000e+01 : f32
      %39 = vector.broadcast %cst_25 : f32 to vector<18x1xf32>
      %40 = arith.divf %38, %39 : vector<18x1xf32>
      %cst_26 = arith.constant 9.99999974E-6 : f32
      %41 = vector.broadcast %cst_26 : f32 to vector<18x1xf32>
      %42 = arith.addf %40, %41 : vector<18x1xf32>
      %43 = math.rsqrt %42 : vector<18x1xf32>
      %44 = vector.broadcast %43 : vector<18x1xf32> to vector<18x32xf32>
      %45 = arith.mulf %35, %44 : vector<18x32xf32>
      %c0_27 = arith.constant 0 : index
      %c0_28 = arith.constant 0 : index
      %46 = vector.load %arg3[%c0_27, %c0_28] : memref<1x32xf32, #tpu.memory_space<vmem>>, vector<1x32xf32>
      %47 = vector.broadcast %46 : vector<1x32xf32> to vector<18x32xf32>
      %48 = arith.mulf %45, %47 : vector<18x32xf32>
      %c0_29 = arith.constant 0 : index
      %c0_30 = arith.constant 0 : index
      %49 = vector.load %arg4[%c0_29, %c0_30] : memref<1x32xf32, #tpu.memory_space<vmem>>, vector<1x32xf32>
      %50 = vector.broadcast %49 : vector<1x32xf32> to vector<18x32xf32>
      %51 = arith.addf %48, %50 : vector<18x32xf32>
      %52 = arith.truncf %51 : vector<18x32xf32> to vector<18x32xbf16>
      %c0_31 = arith.constant 0 : index
      %c0_32 = arith.constant 0 : index
      %53 = vector.load %arg10[%c0_31, %c0_32] : memref<18x32xbf16, #tpu.memory_space<vmem>>, vector<18x32xbf16>
      tpu.vector_store %arg10[%c0_31, %c0_32], %52 {strides = array<i32>} : memref<18x32xbf16, #tpu.memory_space<vmem>>, vector<18x32xbf16>,
      %cst_33 = arith.constant 0.000000e+00 : f32
      %54 = vector.broadcast %cst_33 : f32 to vector<18x32xf32>
      %c0_34 = arith.constant 0 : index
      %c0_35 = arith.constant 0 : index
      %55 = vector.load %arg11[%c0_34, %c0_35] : memref<18x32xf32, #tpu.memory_space<vmem>>, vector<18x32xf32>
      tpu.vector_store %arg11[%c0_34, %c0_35], %54 {strides = array<i32>} : memref<18x32xf32, #tpu.memory_space<vmem>>, vector<18x32xf32>,
    } else {
    }
    %c0 = arith.constant 0 : index
    %c0_1 = arith.constant 0 : index
    %3 = vector.load %arg10[%c0, %c0_1] : memref<18x32xbf16, #tpu.memory_space<vmem>>, vector<18x32xbf16>
    %c0_2 = arith.constant 0 : index
    %c0_3 = arith.constant 0 : index
    %c0_4 = arith.constant 0 : index
    %4 = vector.load %arg5[%c0_2, %c0_3, %c0_4] : memref<1x32x128xbf16, #tpu.memory_space<vmem>>, vector<1x32x128xbf16>
    %5 = vector.shape_cast %4 : vector<1x32x128xbf16> to vector<32x128xbf16>
    %cst = arith.constant dense<0.000000e+00> : vector<18x128xf32>
    %6 = tpu.matmul %3, %5, %cst {dimension_numbers = #tpu.dot_dimension_numbers<[1], [0], [0], [1], [0, 0, 1, 1], [], []>} : vector<18x32xbf16>, vector<32x128xbf16>, vector<18x128xf32> -> vector<18x128xf32>
    %c0_5 = arith.constant 0 : index
    %c0_6 = arith.constant 0 : index
    %c0_7 = arith.constant 0 : index
    %7 = vector.load %arg6[%c0_5, %c0_6, %c0_7] : memref<1x1x128xf32, #tpu.memory_space<vmem>>, vector<1x1x128xf32>
    %8 = vector.shape_cast %7 : vector<1x1x128xf32> to vector<1x128xf32>
    %9 = vector.broadcast %8 : vector<1x128xf32> to vector<18x128xf32>
    %10 = arith.addf %6, %9 : vector<18x128xf32>
    %cst_8 = arith.constant 1.702000e+00 : f32
    %11 = vector.broadcast %cst_8 : f32 to vector<18x128xf32>
    %12 = arith.mulf %11, %10 : vector<18x128xf32>
    %13 = arith.negf %12 : vector<18x128xf32>
    %14 = math.exp %13 : vector<18x128xf32>
    %cst_9 = arith.constant 1.000000e+00 : f32
    %15 = vector.broadcast %cst_9 : f32 to vector<18x128xf32>
    %16 = arith.addf %15, %14 : vector<18x128xf32>
    %17 = arith.divf %15, %16 : vector<18x128xf32>
    %18 = arith.mulf %10, %17 : vector<18x128xf32>
    %c0_10 = arith.constant 0 : index
    %c0_11 = arith.constant 0 : index
    %19 = vector.load %arg11[%c0_10, %c0_11] : memref<18x32xf32, #tpu.memory_space<vmem>>, vector<18x32xf32>
    %20 = arith.truncf %18 : vector<18x128xf32> to vector<18x128xbf16>
    %c0_12 = arith.constant 0 : index
    %c0_13 = arith.constant 0 : index
    %c0_14 = arith.constant 0 : index
    %21 = vector.load %arg7[%c0_12, %c0_13, %c0_14] : memref<1x128x32xbf16, #tpu.memory_space<vmem>>, vector<1x128x32xbf16>
    %22 = vector.shape_cast %21 : vector<1x128x32xbf16> to vector<128x32xbf16>
    %cst_15 = arith.constant dense<0.000000e+00> : vector<18x32xf32>
    %23 = tpu.matmul %20, %22, %cst_15 {dimension_numbers = #tpu.dot_dimension_numbers<[1], [0], [0], [1], [0, 0, 1, 1], [], []>} : vector<18x128xbf16>, vector<128x32xbf16>, vector<18x32xf32> -> vector<18x32xf32>
    %24 = arith.addf %19, %23 : vector<18x32xf32>
    %c0_16 = arith.constant 0 : index
    %c0_17 = arith.constant 0 : index
    %25 = vector.load %arg11[%c0_16, %c0_17] : memref<18x32xf32, #tpu.memory_space<vmem>>, vector<18x32xf32>
    tpu.vector_store %arg11[%c0_16, %c0_17], %24 {strides = array<i32>} : memref<18x32xf32, #tpu.memory_space<vmem>>, vector<18x32xf32>,
    %c0_i32_18 = arith.constant 0 : i32
    %26 = arith.cmpi eq, %arg1, %c0_i32_18 : i32
    %27 = arith.extui %26 : i1 to i32
    %c0_i32_19 = arith.constant 0 : i32
    %28 = arith.cmpi ne, %27, %c0_i32_19 : i32
    scf.if %28 {
      %c0_20 = arith.constant 0 : index
      %c0_21 = arith.constant 0 : index
      %29 = vector.load %arg11[%c0_20, %c0_21] : memref<18x32xf32, #tpu.memory_space<vmem>>, vector<18x32xf32>
      %c0_22 = arith.constant 0 : index
      %c0_23 = arith.constant 0 : index
      %30 = vector.load %arg8[%c0_22, %c0_23] : memref<1x32xf32, #tpu.memory_space<vmem>>, vector<1x32xf32>
      %31 = vector.broadcast %30 : vector<1x32xf32> to vector<18x32xf32>
      %32 = arith.addf %29, %31 : vector<18x32xf32>
      %c0_24 = arith.constant 0 : index
      %c0_25 = arith.constant 0 : index
      %33 = vector.load %arg2[%c0_24, %c0_25] : memref<18x32xf32, #tpu.memory_space<vmem>>, vector<18x32xf32>
      %34 = arith.addf %32, %33 : vector<18x32xf32>
      %c0_26 = arith.constant 0 : index
      %c0_27 = arith.constant 0 : index
      %35 = vector.load %arg9[%c0_26, %c0_27] : memref<18x32xf32, #tpu.memory_space<vmem>>, vector<18x32xf32>
      tpu.vector_store %arg9[%c0_26, %c0_27], %34 {strides = array<i32>} : memref<18x32xf32, #tpu.memory_space<vmem>>, vector<18x32xf32>,
    } else {
    }
    return
  }
  func.func @transform_0(%arg0: i32, %arg1: i32) -> (i32, i32) {
    %c0_i32 = arith.constant 0 : i32
    %c0_i32_0 = arith.constant 0 : i32
    return %arg0, %c0_i32 : i32, i32
  }
  func.func @transform_1(%arg0: i32, %arg1: i32) -> (i32, i32) {
    %c0_i32 = arith.constant 0 : i32
    %c0_i32_0 = arith.constant 0 : i32
    %c0_i32_1 = arith.constant 0 : i32
    return %c0_i32, %c0_i32_0 : i32, i32
  }
  func.func @transform_2(%arg0: i32, %arg1: i32) -> (i32, i32) {
    %c0_i32 = arith.constant 0 : i32
    %c0_i32_0 = arith.constant 0 : i32
    %c0_i32_1 = arith.constant 0 : i32
    return %c0_i32, %c0_i32_0 : i32, i32
  }
  func.func @transform_3(%arg0: i32, %arg1: i32) -> (i32, i32, i32) {
    %c0_i32 = arith.constant 0 : i32
    %c0_i32_0 = arith.constant 0 : i32
    %c0_i32_1 = arith.constant 0 : i32
    return %arg1, %c0_i32, %c0_i32_0 : i32, i32, i32
  }
  func.func @transform_4(%arg0: i32, %arg1: i32) -> (i32, i32, i32) {
    %c0_i32 = arith.constant 0 : i32
    %c0_i32_0 = arith.constant 0 : i32
    %c0_i32_1 = arith.constant 0 : i32
    return %arg1, %c0_i32, %c0_i32_0 : i32, i32, i32
  }
  func.func @transform_5(%arg0: i32, %arg1: i32) -> (i32, i32, i32) {
    %c0_i32 = arith.constant 0 : i32
    %c0_i32_0 = arith.constant 0 : i32
    %c0_i32_1 = arith.constant 0 : i32
    return %arg1, %c0_i32, %c0_i32_0 : i32, i32, i32
  }
  func.func @transform_6(%arg0: i32, %arg1: i32) -> (i32, i32) {
    %c0_i32 = arith.constant 0 : i32
    %c0_i32_0 = arith.constant 0 : i32
    %c0_i32_1 = arith.constant 0 : i32
    return %c0_i32, %c0_i32_0 : i32, i32
  }
  func.func @transform_7(%arg0: i32, %arg1: i32) -> (i32, i32) {
    %c0_i32 = arith.constant 0 : i32
    %c0_i32_0 = arith.constant 0 : i32
    return %arg0, %c0_i32 : i32, i32
  }
}

module attributes {stable_mosaic.version = 11 : i64} {
  func.func @l2norm_kernel(%arg0: i32, %arg1: memref<8x32xf32, #tpu.memory_space<vmem>>, %arg2: memref<8x32xf32, #tpu.memory_space<vmem>>) attributes {dimension_semantics = [#tpu.dimension_semantics<parallel>], iteration_bounds = array<i64: 1>, scalar_prefetch = 0 : i64, scratch_operands = 0 : i64, tpu.core_type = #tpu.core_type<tc>, window_params = [{transform_indices = @transform_0, window_bounds = array<i64: 8, 32>}, {transform_indices = @transform_1, window_bounds = array<i64: 8, 32>}]} {
    %c0 = arith.constant 0 : index
    %c0_0 = arith.constant 0 : index
    %0 = vector.load %arg1[%c0, %c0_0] : memref<8x32xf32, #tpu.memory_space<vmem>>, vector<8x32xf32>
    %1 = arith.mulf %0, %0 : vector<8x32xf32>
    %cst = arith.constant dense<0.000000e+00> : vector<8xf32>
    %2 = vector.multi_reduction <add>, %1, %cst [1] : vector<8x32xf32> to vector<8xf32>
    %3 = vector.shape_cast %2 : vector<8xf32> to vector<8x1xf32>
    %4 = math.rsqrt %3 : vector<8x1xf32>
    %5 = vector.broadcast %4 : vector<8x1xf32> to vector<8x32xf32>
    %6 = arith.mulf %0, %5 : vector<8x32xf32>
    %c0_1 = arith.constant 0 : index
    %c0_2 = arith.constant 0 : index
    %7 = vector.load %arg2[%c0_1, %c0_2] : memref<8x32xf32, #tpu.memory_space<vmem>>, vector<8x32xf32>
    tpu.vector_store %arg2[%c0_1, %c0_2], %6 {strides = array<i32>} : memref<8x32xf32, #tpu.memory_space<vmem>>, vector<8x32xf32>,
    return
  }
  func.func @transform_0(%arg0: i32) -> (i32, i32) {
    %c0_i32 = arith.constant 0 : i32
    %c0_i32_0 = arith.constant 0 : i32
    return %arg0, %c0_i32 : i32, i32
  }
  func.func @transform_1(%arg0: i32) -> (i32, i32) {
    %c0_i32 = arith.constant 0 : i32
    %c0_i32_0 = arith.constant 0 : i32
    return %arg0, %c0_i32 : i32, i32
  }
}

module attributes {stable_mosaic.version = 11 : i64} {
  func.func @final_head_kernel(%arg0: i32, %arg1: memref<18x32xf32, #tpu.memory_space<vmem>>, %arg2: memref<1x32xf32, #tpu.memory_space<vmem>>, %arg3: memref<1x32xf32, #tpu.memory_space<vmem>>, %arg4: memref<1x32xf32, #tpu.memory_space<vmem>>, %arg5: memref<1x32xf32, #tpu.memory_space<vmem>>, %arg6: memref<32x16xbf16, #tpu.memory_space<vmem>>, %arg7: memref<18x16xf32, #tpu.memory_space<vmem>>) attributes {dimension_semantics = [#tpu.dimension_semantics<parallel>], iteration_bounds = array<i64: 1>, scalar_prefetch = 0 : i64, scratch_operands = 0 : i64, tpu.core_type = #tpu.core_type<tc>, window_params = [{transform_indices = @transform_0, window_bounds = array<i64: 18, 32>}, {pipeline_mode = #tpu.pipeline_mode<synchronous>, transform_indices = @transform_1, window_bounds = array<i64: 1, 32>}, {pipeline_mode = #tpu.pipeline_mode<synchronous>, transform_indices = @transform_2, window_bounds = array<i64: 1, 32>}, {pipeline_mode = #tpu.pipeline_mode<synchronous>, transform_indices = @transform_3, window_bounds = array<i64: 1, 32>}, {pipeline_mode = #tpu.pipeline_mode<synchronous>, transform_indices = @transform_4, window_bounds = array<i64: 1, 32>}, {pipeline_mode = #tpu.pipeline_mode<synchronous>, transform_indices = @transform_5, window_bounds = array<i64: 32, 16>}, {transform_indices = @transform_6, window_bounds = array<i64: 18, 16>}]} {
    %c0 = arith.constant 0 : index
    %c0_0 = arith.constant 0 : index
    %0 = vector.load %arg1[%c0, %c0_0] : memref<18x32xf32, #tpu.memory_space<vmem>>, vector<18x32xf32>
    %c0_1 = arith.constant 0 : index
    %c0_2 = arith.constant 0 : index
    %1 = vector.load %arg2[%c0_1, %c0_2] : memref<1x32xf32, #tpu.memory_space<vmem>>, vector<1x32xf32>
    %c0_3 = arith.constant 0 : index
    %c0_4 = arith.constant 0 : index
    %2 = vector.load %arg3[%c0_3, %c0_4] : memref<1x32xf32, #tpu.memory_space<vmem>>, vector<1x32xf32>
    %cst = arith.constant dense<0.000000e+00> : vector<18xf32>
    %3 = vector.multi_reduction <add>, %0, %cst [1] : vector<18x32xf32> to vector<18xf32>
    %4 = vector.shape_cast %3 : vector<18xf32> to vector<18x1xf32>
    %cst_5 = arith.constant 3.200000e+01 : f32
    %5 = vector.broadcast %cst_5 : f32 to vector<18x1xf32>
    %6 = arith.divf %4, %5 : vector<18x1xf32>
    %7 = vector.broadcast %6 : vector<18x1xf32> to vector<18x32xf32>
    %8 = arith.subf %0, %7 : vector<18x32xf32>
    %9 = arith.mulf %8, %8 : vector<18x32xf32>
    %cst_6 = arith.constant dense<0.000000e+00> : vector<18xf32>
    %10 = vector.multi_reduction <add>, %9, %cst_6 [1] : vector<18x32xf32> to vector<18xf32>
    %11 = vector.shape_cast %10 : vector<18xf32> to vector<18x1xf32>
    %cst_7 = arith.constant 3.200000e+01 : f32
    %12 = vector.broadcast %cst_7 : f32 to vector<18x1xf32>
    %13 = arith.divf %11, %12 : vector<18x1xf32>
    %cst_8 = arith.constant 9.99999997E-7 : f32
    %14 = vector.broadcast %cst_8 : f32 to vector<18x1xf32>
    %15 = arith.addf %13, %14 : vector<18x1xf32>
    %16 = math.rsqrt %15 : vector<18x1xf32>
    %17 = vector.broadcast %16 : vector<18x1xf32> to vector<18x32xf32>
    %18 = arith.mulf %8, %17 : vector<18x32xf32>
    %19 = vector.broadcast %1 : vector<1x32xf32> to vector<18x32xf32>
    %20 = arith.mulf %18, %19 : vector<18x32xf32>
    %21 = vector.broadcast %2 : vector<1x32xf32> to vector<18x32xf32>
    %22 = arith.addf %20, %21 : vector<18x32xf32>
    %c0_9 = arith.constant 0 : index
    %c0_10 = arith.constant 0 : index
    %23 = vector.load %arg4[%c0_9, %c0_10] : memref<1x32xf32, #tpu.memory_space<vmem>>, vector<1x32xf32>
    %c0_11 = arith.constant 0 : index
    %c0_12 = arith.constant 0 : index
    %24 = vector.load %arg5[%c0_11, %c0_12] : memref<1x32xf32, #tpu.memory_space<vmem>>, vector<1x32xf32>
    %cst_13 = arith.constant dense<0.000000e+00> : vector<18xf32>
    %25 = vector.multi_reduction <add>, %22, %cst_13 [1] : vector<18x32xf32> to vector<18xf32>
    %26 = vector.shape_cast %25 : vector<18xf32> to vector<18x1xf32>
    %cst_14 = arith.constant 3.200000e+01 : f32
    %27 = vector.broadcast %cst_14 : f32 to vector<18x1xf32>
    %28 = arith.divf %26, %27 : vector<18x1xf32>
    %29 = vector.broadcast %28 : vector<18x1xf32> to vector<18x32xf32>
    %30 = arith.subf %22, %29 : vector<18x32xf32>
    %31 = arith.mulf %30, %30 : vector<18x32xf32>
    %cst_15 = arith.constant dense<0.000000e+00> : vector<18xf32>
    %32 = vector.multi_reduction <add>, %31, %cst_15 [1] : vector<18x32xf32> to vector<18xf32>
    %33 = vector.shape_cast %32 : vector<18xf32> to vector<18x1xf32>
    %cst_16 = arith.constant 3.200000e+01 : f32
    %34 = vector.broadcast %cst_16 : f32 to vector<18x1xf32>
    %35 = arith.divf %33, %34 : vector<18x1xf32>
    %cst_17 = arith.constant 9.99999974E-6 : f32
    %36 = vector.broadcast %cst_17 : f32 to vector<18x1xf32>
    %37 = arith.addf %35, %36 : vector<18x1xf32>
    %38 = math.rsqrt %37 : vector<18x1xf32>
    %39 = vector.broadcast %38 : vector<18x1xf32> to vector<18x32xf32>
    %40 = arith.mulf %30, %39 : vector<18x32xf32>
    %41 = vector.broadcast %23 : vector<1x32xf32> to vector<18x32xf32>
    %42 = arith.mulf %40, %41 : vector<18x32xf32>
    %43 = vector.broadcast %24 : vector<1x32xf32> to vector<18x32xf32>
    %44 = arith.addf %42, %43 : vector<18x32xf32>
    %45 = arith.truncf %44 : vector<18x32xf32> to vector<18x32xbf16>
    %c0_18 = arith.constant 0 : index
    %c0_19 = arith.constant 0 : index
    %46 = vector.load %arg6[%c0_18, %c0_19] : memref<32x16xbf16, #tpu.memory_space<vmem>>, vector<32x16xbf16>
    %cst_20 = arith.constant dense<0.000000e+00> : vector<18x16xf32>
    %47 = tpu.matmul %45, %46, %cst_20 {dimension_numbers = #tpu.dot_dimension_numbers<[1], [0], [0], [1], [0, 0, 1, 1], [], []>} : vector<18x32xbf16>, vector<32x16xbf16>, vector<18x16xf32> -> vector<18x16xf32>
    %c0_21 = arith.constant 0 : index
    %c0_22 = arith.constant 0 : index
    %48 = vector.load %arg7[%c0_21, %c0_22] : memref<18x16xf32, #tpu.memory_space<vmem>>, vector<18x16xf32>
    tpu.vector_store %arg7[%c0_21, %c0_22], %47 {strides = array<i32>} : memref<18x16xf32, #tpu.memory_space<vmem>>, vector<18x16xf32>,
    return
  }
  func.func @transform_0(%arg0: i32) -> (i32, i32) {
    %c0_i32 = arith.constant 0 : i32
    %c0_i32_0 = arith.constant 0 : i32
    return %arg0, %c0_i32 : i32, i32
  }
  func.func @transform_1(%arg0: i32) -> (i32, i32) {
    %c0_i32 = arith.constant 0 : i32
    %c0_i32_0 = arith.constant 0 : i32
    %c0_i32_1 = arith.constant 0 : i32
    return %c0_i32, %c0_i32_0 : i32, i32
  }
  func.func @transform_2(%arg0: i32) -> (i32, i32) {
    %c0_i32 = arith.constant 0 : i32
    %c0_i32_0 = arith.constant 0 : i32
    %c0_i32_1 = arith.constant 0 : i32
    return %c0_i32, %c0_i32_0 : i32, i32
  }
  func.func @transform_3(%arg0: i32) -> (i32, i32) {
    %c0_i32 = arith.constant 0 : i32
    %c0_i32_0 = arith.constant 0 : i32
    %c0_i32_1 = arith.constant 0 : i32
    return %c0_i32, %c0_i32_0 : i32, i32
  }
  func.func @transform_4(%arg0: i32) -> (i32, i32) {
    %c0_i32 = arith.constant 0 : i32
    %c0_i32_0 = arith.constant 0 : i32
    %c0_i32_1 = arith.constant 0 : i32
    return %c0_i32, %c0_i32_0 : i32, i32
  }
  func.func @transform_5(%arg0: i32) -> (i32, i32) {
    %c0_i32 = arith.constant 0 : i32
    %c0_i32_0 = arith.constant 0 : i32
    %c0_i32_1 = arith.constant 0 : i32
    return %c0_i32, %c0_i32_0 : i32, i32
  }
  func.func @transform_6(%arg0: i32) -> (i32, i32) {
    %c0_i32 = arith.constant 0 : i32
    %c0_i32_0 = arith.constant 0 : i32
    return %arg0, %c0_i32 : i32, i32
  }
}

module attributes {stable_mosaic.version = 11 : i64} {
  func.func @l2norm_kernel(%arg0: i32, %arg1: memref<8x16xf32, #tpu.memory_space<vmem>>, %arg2: memref<8x16xf32, #tpu.memory_space<vmem>>) attributes {dimension_semantics = [#tpu.dimension_semantics<parallel>], iteration_bounds = array<i64: 1>, scalar_prefetch = 0 : i64, scratch_operands = 0 : i64, tpu.core_type = #tpu.core_type<tc>, window_params = [{transform_indices = @transform_0, window_bounds = array<i64: 8, 16>}, {transform_indices = @transform_1, window_bounds = array<i64: 8, 16>}]} {
    %c0 = arith.constant 0 : index
    %c0_0 = arith.constant 0 : index
    %0 = vector.load %arg1[%c0, %c0_0] : memref<8x16xf32, #tpu.memory_space<vmem>>, vector<8x16xf32>
    %1 = arith.mulf %0, %0 : vector<8x16xf32>
    %cst = arith.constant dense<0.000000e+00> : vector<8xf32>
    %2 = vector.multi_reduction <add>, %1, %cst [1] : vector<8x16xf32> to vector<8xf32>
    %3 = vector.shape_cast %2 : vector<8xf32> to vector<8x1xf32>
    %4 = math.rsqrt %3 : vector<8x1xf32>
    %5 = vector.broadcast %4 : vector<8x1xf32> to vector<8x16xf32>
    %6 = arith.mulf %0, %5 : vector<8x16xf32>
    %c0_1 = arith.constant 0 : index
    %c0_2 = arith.constant 0 : index
    %7 = vector.load %arg2[%c0_1, %c0_2] : memref<8x16xf32, #tpu.memory_space<vmem>>, vector<8x16xf32>
    tpu.vector_store %arg2[%c0_1, %c0_2], %6 {strides = array<i32>} : memref<8x16xf32, #tpu.memory_space<vmem>>, vector<8x16xf32>,
    return
  }
  func.func @transform_0(%arg0: i32) -> (i32, i32) {
    %c0_i32 = arith.constant 0 : i32
    %c0_i32_0 = arith.constant 0 : i32
    return %arg0, %c0_i32 : i32, i32
  }
  func.func @transform_1(%arg0: i32) -> (i32, i32) {
    %c0_i32 = arith.constant 0 : i32
    %c0_i32_0 = arith.constant 0 : i32
    return %arg0, %c0_i32 : i32, i32
  }
}

</mosaic_0001>

<bundles_post_ra>
// kernel: vpt_clip_forward.12
= control target key start
LH: loop header
LB: loop body
LE: loop exit
PB: predicated region body
PF: predicated region fallthrough
CT: control target
= control target key end

     0   :  { %v108_v0 = vmov 0.0   ;;  %vm109_vm0 = vmmov 0   ;;  %vm40_vm1 = vcmask 261120   ;;  %s145_s1 = inlined_call_operand.vmem [shape: bf16[32,32], index: 1, kind: input, shape index: {}]   ;;  %s146_s0 = inlined_call_operand.vmem [shape: f32[8,32], index: 0, kind: input, shape index: {}]   ;;  %s147_s2 = inlined_call_operand.vmem [shape: f32[1,32], index: 2, kind: input, shape index: {}]   ;;  %s148_s3 = inlined_call_operand.vmem [shape: f32[8,32], index: 3, kind: output, shape index: {}]  }
   0x1   :  { %96 = vmatprep.subr.bf16.mxu0 %v108_v0  ;;  %v106_v1 = vld [vmem:[%s145_s1] sm:$0xff]   ;;  %100 = vmatprep.mubr.msk.bf16.mxu0 %vm109_vm0, %v108_v0  ;;  %v107_v2 = vld [vmem:[%s145_s1 + $0x8] sm:$0xff]  }
   0x2   :  { %97 = vmatpush3.bf16.msra.mxu0 %v106_v1  ;;  %v15_v3 = vld [vmem:[%s146_s0] sm:$0xff] }
   0x3   :  { %98 = vmatprep.subr.bf16.mxu0 %v108_v0  ;;  %v16_v4 = vpack.c.bf16 %v15_v3, %v15_v3  ;;  %v89_v5 = vld [vmem:[%s147_s2] ss:$0 sm:$0xff] }
   0x6   :  { %99 = vmatpush3.bf16.msra.mxu0 %v107_v2 }
   0x9   :  { %101 = vmatmul.mubr.msk.bf16.vlgmr.msra.gmra.mrb[0].mxu0 %vm40_vm1, %v16_v4 }
  0xdc   :  { %v78_v6 = vpop.f32.mrb[0].mxu0 }
  0xdd   :  { %v79_v7 = vadd.f32 %v89_v5, %v78_v6  ;;  %v102_v8 = vpop.f32.mrb[1].mxu0 }
  0xde   :  { %v81_v9 = vpop.f32.mrb[2].mxu0 }
  0xdf   :  { %84 = vst.msk [vmem:[%s148_s3] sm:$0xff] %vm40_vm1, %v79_v7  ;;  %v103_v10 = vpop.f32.mrb[3].mxu0 }

// kernel: vpt_clip_forward.11
= control target key start
LH: loop header
LB: loop body
LE: loop exit
PB: predicated region body
PF: predicated region fallthrough
CT: control target
= control target key end

     0   :  { %s1184_s18 = smov 0   ;;  %s1186_s19 = smov 0   ;;  %s1386_s0 = inlined_call_operand.vmem [shape: f32[2,4,768], index: 0, kind: input, shape index: {}]   ;;  %s1387_s1 = inlined_call_operand.vmem [shape: bf16[768,32], index: 1, kind: input, shape index: {}]   ;;  %s1388_s2 = inlined_call_operand.vmem [shape: f32[4,32], index: 2, kind: input, shape index: {}]   ;;  %s1389_s3 = inlined_call_operand.vmem [shape: f32[1,32], index: 3, kind: input, shape index: {}]   ;;  %s1390_s4 = inlined_call_operand.vmem [shape: f32[1,32], index: 4, kind: input, shape index: {}]   ;;  %s1391_s5 = inlined_call_operand.vmem [shape: f32[2,4,32], index: 5, kind: output, shape index: {}]  }
   0x1   :  { %s1188_s20 = smov 0  }
   0x2 LB: > { %s27_s21 = sadd.s32 1, %s1148_s19  ;;  %p931_p0 = scmp.ge.s32.totalorder %s1152_s20, 1  ;;  %s1152_s20 = sphi %s1188_s20, %s15_s20   ;;  %s1148_s19 = sphi %s1186_s19, %s1393_s19   ;;  %s1144_s18 = sphi %s1184_s18, %s1392_s18  }
   0x3   : > { %p29_p1 = scmp.ge.s32.totalorder %s27_s21, 2  ;;  %p216_p2 = scmp.lt.s32.totalorder %s1152_s20, 3 }
   0x5   : > { %s1395_s21 = smov (%p29_p1, %s27_s21), 0  ;;  %p217_p3 = pnand %p931_p0, %p216_p2 }
   0x6   : > { %v1077_v0 = vld [vmem:[%s1387_s1 + $0x40] sm:$0xff] (!%p217_p3)   ;;  %v1081_v4 = vld [vmem:[%s1387_s1 + $0x48] sm:$0xff] (!%p217_p3)   ;;  %v1085_v8 = vld [vmem:[%s1387_s1 + $0x50] sm:$0xff] (!%p217_p3)   ;;  %p254_p4 = scmp.lt.s32.totalorder (!%p217_p3), %s1144_s18, 1  ;;  %vm798_vm0 = vcmask (!%p217_p3), 257024  }
   0x7   : > { %220 = sbr.rel (%p217_p3) target bundleno = 602 (0x25a), region = 40  ;;  %v1078_v1 = vld [vmem:[%s1387_s1] sm:$0xff] (!%p217_p3)   ;;  %986 = vmatprep.subr.bf16.mxu0 (!%p217_p3), %v1077_v0  ;;  %v1082_v5 = vld [vmem:[%s1387_s1 + $0x8] sm:$0xff] (!%p217_p3)   ;;  %v1086_v9 = vld [vmem:[%s1387_s1 + $0x10] sm:$0xff] (!%p217_p3)  }
   0x8   : > { %v1079_v2 = vld [vmem:[%s1387_s1 + $0xc0] sm:$0xff] (!%p217_p3)   ;;  %987 = vmatpush3.bf16.msra.mxu0 (!%p217_p3), %v1078_v1  ;;  %v1083_v6 = vld [vmem:[%s1387_s1 + $0xc8] sm:$0xff] (!%p217_p3)   ;;  %v1087_v10 = vld [vmem:[%s1387_s1 + $0xd0] sm:$0xff] (!%p217_p3)  }
   0x9   : > { %v1080_v3 = vld [vmem:[%s1387_s1 + $0x80] sm:$0xff] (!%p217_p3)   ;;  %1008 = vmatprep.subr.bf16.mxu1 (!%p217_p3), %v1079_v2  ;;  %988 = vmatprep.subr.bf16.mxu0 (!%p217_p3), %v1081_v4  ;;  %v1084_v7 = vld [vmem:[%s1387_s1 + $0x88] sm:$0xff] (!%p217_p3)   ;;  %v1088_v11 = vld [vmem:[%s1387_s1 + $0x90] sm:$0xff] (!%p217_p3)  }
   0xa   : > { %1009 = vmatpush3.bf16.msra.mxu1 (!%p217_p3), %v1080_v3  ;;  %v1089_v12 = vld [vmem:[%s1387_s1 + $0x58] sm:$0xff] (!%p217_p3)   ;;  %v1093_v16 = vld [vmem:[%s1387_s1 + $0x60] sm:$0xff] (!%p217_p3)   ;;  %v1097_v20 = vld [vmem:[%s1387_s1 + $0x68] sm:$0xff] (!%p217_p3)  }
   0xb   : > { %1010 = vmatprep.subr.bf16.mxu1 (!%p217_p3), %v1083_v6  ;;  %v1090_v13 = vld [vmem:[%s1387_s1 + $0x18] sm:$0xff] (!%p217_p3)   ;;  %v1094_v17 = vld [vmem:[%s1387_s1 + $0x20] sm:$0xff] (!%p217_p3)   ;;  %v1098_v21 = vld [vmem:[%s1387_s1 + $0x28] sm:$0xff] (!%p217_p3)  }
   0xc   : > { %989 = vmatpush3.bf16.msra.mxu0 (!%p217_p3), %v1082_v5  ;;  %v1091_v14 = vld [vmem:[%s1387_s1 + $0xd8] sm:$0xff] (!%p217_p3)   ;;  %v1095_v18 = vld [vmem:[%s1387_s1 + $0xe0] sm:$0xff] (!%p217_p3)   ;;  %v1099_v22 = vld [vmem:[%s1387_s1 + $0xe8] sm:$0xff] (!%p217_p3)  }
   0xd   : > { %990 = vmatprep.subr.bf16.mxu0 (!%p217_p3), %v1085_v8  ;;  %v1092_v15 = vld [vmem:[%s1387_s1 + $0x98] sm:$0xff] (!%p217_p3)   ;;  %v1096_v19 = vld [vmem:[%s1387_s1 + $0xa0] sm:$0xff] (!%p217_p3)   ;;  %v1100_v23 = vld [vmem:[%s1387_s1 + $0xa8] sm:$0xff] (!%p217_p3)  }
   0xe   : > { %1011 = vmatpush3.bf16.msra.mxu1 %v1084_v7  ;;  %s1397_s18 = smov (!%p254_p4, %s1144_s18), 1  ;;  %v1101_v24 = vld [vmem:[%s1387_s1 + $0x70] sm:$0xff]   ;;  %v1105_v28 = vld [vmem:[%s1387_s1 + $0x78] sm:$0xff]   ;;  %v1110_v35 = vld [vmem:[%s1387_s1 + $0x140] sm:$0xff]  }
   0xf   : > { %1012 = vmatprep.subr.bf16.mxu1 %v1087_v10  ;;  %s1052_s30 = smul.u32 24, %s1397_s18  ;;  %v1102_v25 = vld [vmem:[%s1387_s1 + $0x30] sm:$0xff]   ;;  %v1106_v29 = vld [vmem:[%s1387_s1 + $0x38] sm:$0xff]   ;;  %v1112_v39 = vld [vmem:[%s1387_s1 + $0x100] sm:$0xff]   ;;  %s933_s22 = sshll.u32 %s1397_s18, 2 }
  0x10   : > { %991 = vmatpush3.bf16.msra.mxu0 %v1086_v9  ;;  %v1103_v26 = vld [vmem:[%s1387_s1 + $0xf0] sm:$0xff]   ;;  %v1107_v30 = vld [vmem:[%s1387_s1 + $0xf8] sm:$0xff]   ;;  %v1113_v41 = vld [vmem:[%s1387_s1 + $0x148] sm:$0xff]   ;;  %s273_s27 = scalar_lea.vmem %s1391_s5, %s933_s22 }
  0x11   : > { %992 = vmatprep.subr.bf16.mxu0 %v1089_v12  ;;  %v1104_v27 = vld [vmem:[%s1387_s1 + $0xb0] sm:$0xff]   ;;  %s1299_s16 = scalar_lea.vmem %s1386_s0, %s1052_s30  ;;  %v1109_v33 = vld [vmem:[%s1387_s1 + $0xb8] sm:$0xff]   ;;  %v1114_v43 = vld [vmem:[%s1387_s1 + $0x108] sm:$0xff]  }
  0x12   : > { %1013 = vmatpush3.bf16.msra.mxu1 %v1088_v11  ;;  %v275_v31 = vld [vmem:[%s1299_s16] sm:$0xff]  ;;  %v276_v36 = vld [vmem:[%s1299_s16 + $0x8] sm:$0xff]  ;;  %v1115_v44 = vld [vmem:[%s1387_s1 + $0x150] sm:$0xff]  }
  0x13   : > { %1014 = vmatprep.subr.bf16.mxu1 %v1091_v14  ;;  %v281_v32 = vcombine.high %v275_v31, %v275_v31  ;;  %v287_v34 = vpack.c.bf16 %v275_v31, %v275_v31  ;;  %v282_v38 = vcombine.high %v276_v36, %v276_v36  ;;  %v289_v40 = vpack.c.bf16 %v276_v36, %v276_v36  ;;  %v1116_v45 = vld [vmem:[%s1387_s1 + $0x110] sm:$0xff]   ;;  %v1117_v46 = vld [vmem:[%s1387_s1 + $0x158] sm:$0xff]   ;;  %v1119_v48 = vld [vmem:[%s1387_s1 + $0x160] sm:$0xff]  }
  0x14   : > { %993 = vmatpush3.bf16.msra.mxu0 %v1090_v13  ;;  %v1118_v47 = vld [vmem:[%s1387_s1 + $0x118] sm:$0xff]   ;;  %v277_v49 = vld [vmem:[%s1299_s16 + $0x10] sm:$0xff]  ;;  %v1120_v51 = vld [vmem:[%s1387_s1 + $0x120] sm:$0xff]  }
  0x15   : > { %994 = vmatprep.subr.bf16.mxu0 %v1093_v16  ;;  %v288_v37 = vpack.c.bf16 %v281_v32, %v281_v32  ;;  %v290_v42 = vpack.c.bf16 %v282_v38, %v282_v38  ;;  %v283_v50 = vcombine.high %v277_v49, %v277_v49  ;;  %v1121_v52 = vld [vmem:[%s1387_s1 + $0x168] sm:$0xff]   ;;  %v1123_v55 = vld [vmem:[%s1387_s1 + $0x170] sm:$0xff]   ;;  %v1125_v57 = vld [vmem:[%s1387_s1 + $0x178] sm:$0xff]   ;;  %v291_v59 = vpack.c.bf16 %v277_v49, %v277_v49 }
  0x16   : > { %1015 = vmatpush3.bf16.msra.mxu1 %v1092_v15  ;;  %v1122_v54 = vld [vmem:[%s1387_s1 + $0x128] sm:$0xff]   ;;  %v1124_v56 = vld [vmem:[%s1387_s1 + $0x130] sm:$0xff]   ;;  %v1126_v58 = vld [vmem:[%s1387_s1 + $0x138] sm:$0xff]  }
  0x17   : > { %1016 = vmatprep.subr.bf16.mxu1 %v1095_v18  ;;  %710 = vmatprep.mubr.bf16.mxu0 %v288_v37  ;;  %v292_v53 = vpack.c.bf16 %v283_v50, %v283_v50  ;;  %v389_v61 = vld [vmem:[%s1388_s2] sm:$0xf] }
  0x18   : > { %995 = vmatpush3.bf16.msra.mxu0 %v1094_v17  ;;  %750 = vmatprep.mubr.bf16.mxu1 %v290_v42 }
  0x19   : > { %996 = vmatprep.subr.bf16.mxu0 %v1097_v20 }
  0x1a   : > { %1017 = vmatpush3.bf16.msra.mxu1 %v1096_v19 }
  0x1b   : > { %1018 = vmatprep.subr.bf16.mxu1 %v1099_v22 }
  0x1c   : > { %997 = vmatpush3.bf16.msra.mxu0 %v1098_v21 }
  0x1d   : > { %998 = vmatprep.subr.bf16.mxu0 %v1101_v24 }
  0x1e   : > { %1019 = vmatpush3.bf16.msra.mxu1 %v1100_v23 }
  0x1f   : > { %1020 = vmatprep.subr.bf16.mxu1 %v1103_v26 }
  0x20   : > { %999 = vmatpush3.bf16.msra.mxu0 %v1102_v25  ;;  %v982_v25 = vld [vmem:[%s1389_s3] ss:$0 sm:$0xff] }
  0x21   : > { %1000 = vmatprep.subr.bf16.mxu0 %v1105_v28 }
  0x22   : > { %1021 = vmatpush3.bf16.msra.mxu1 %v1104_v27  ;;  %v983_v27 = vld [vmem:[%s1390_s4] ss:$0 sm:$0xff] }
  0x23   : > { %1022 = vmatprep.subr.bf16.mxu1 %v1107_v30 }
  0x24   : > { %1001 = vmatpush3.bf16.msra.mxu0 %v1106_v29 }
  0x25   : > { %1030 = vmatprep.subr.bf16.mxu0 %v1110_v35 }
  0x26   : > { %1023 = vmatpush3.bf16.msra.mxu1 %v1109_v33 }
  0x27   : > { %711 = vmatmul.mubr.bf16.vlgmr.msra.gmra.mrb[0].mxu0 %v287_v34 }
  0x28   : > { %1031 = vmatpush3.bf16.msra.mxu0 %v1112_v39  ;;  %790 = vmatprep.mubr.bf16.mxu0 %v292_v53 }
  0x29   : > { %751 = vmatmul.mubr.bf16.vlgmr.msra.gmra.mrb[0].mxu1 %v289_v40  ;;  %1032 = vmatprep.subr.bf16.mxu0 %v1113_v41 }
  0x2c   : > { %1033 = vmatpush3.bf16.msra.mxu0 %v1114_v43 }
  0x2d   : > { %1034 = vmatprep.subr.bf16.mxu0 %v1115_v44 }
  0x30   : > { %1035 = vmatpush3.bf16.msra.mxu0 %v1116_v45 }
  0x31   : > { %1036 = vmatprep.subr.bf16.mxu0 %v1117_v46 }
  0x34   : > { %1037 = vmatpush3.bf16.msra.mxu0 %v1118_v47 }
  0x35   : > { %1038 = vmatprep.subr.bf16.mxu0 %v1119_v48 }
  0x38   : > { %1039 = vmatpush3.bf16.msra.mxu0 %v1120_v51 }
  0x39   : > { %1040 = vmatprep.subr.bf16.mxu0 %v1121_v52 }
  0x3c   : > { %1041 = vmatpush3.bf16.msra.mxu0 %v1122_v54 }
  0x3d   : > { %1042 = vmatprep.subr.bf16.mxu0 %v1123_v55 }
  0x40   : > { %1043 = vmatpush3.bf16.msra.mxu0 %v1124_v56 }
  0x41   : > { %1044 = vmatprep.subr.bf16.mxu0 %v1125_v57 }
  0x44   : > { %1045 = vmatpush3.bf16.msra.mxu0 %v1126_v58 }
  0x47   : > { %791 = vmatmul.mubr.bf16.vlgmr.msra.gmra.mrb[4].mxu0 %v291_v59 }
  0xfa   : > { %v1002_v60 = vpop.f32.mrb[0].mxu0 }
  0xfb   : > { %v1003_v62 = vpop.f32.mrb[1].mxu0 }
  0xfc   : > { %v1004_v63 = vadd.f32 %v1003_v62, %v1002_v60  ;;  %v1005_v0 = vpop.f32.mrb[2].mxu0  ;;  %v1024_v1 = vpop.f32.mrb[0].mxu1 }
  0xfd   : > { %v1006_v2 = vpop.f32.mrb[3].mxu0  ;;  %v1025_v3 = vpop.f32.mrb[1].mxu1 }
  0xfe   : > { %v713_v4 = vadd.f32 %v1004_v63, %v389_v61  ;;  %v1026_v5 = vadd.f32 %v1025_v3, %v1024_v1  ;;  %v1027_v6 = vpop.f32.mrb[2].mxu1 }
  0xff   : > { %v1028_v7 = vpop.f32.mrb[3].mxu1 }
 0x100   : > { %v753_v8 = vadd.f32 %v1026_v5, %v713_v4 }
 0x11a   : > { %v1046_v9 = vpop.f32.mrb[4].mxu0 }
 0x11b   : > { %v1047_v10 = vpop.f32.mrb[5].mxu0 }
 0x11c   : > { %v1048_v11 = vadd.f32 %v1047_v10, %v1046_v9  ;;  %v1049_v12 = vpop.f32.mrb[6].mxu0 }
 0x11d   : > { %v1050_v13 = vpop.f32.mrb[7].mxu0 }
 0x11e   : > { %v793_v14 = vadd.f32 %v1048_v11, %v753_v8 }
 0x120   : > { %v799_v15 = vsel %vm798_vm0, %v793_v14, 0.0 }
 0x121   : > { %800 = vadd.xlane.f32.xlu0 %v799_v15 }
 0x1ae   : > { %v801_v16 = vpop.xlane.xlu0 %800 }
 0x1af   : > { %v803_v17 = vmul.f32 0.03125, %v801_v16 }
 0x1b1   : > { %v804_v18 = vsub.f32 %v793_v14, %v803_v17 }
 0x1b3   : > { %v805_v19 = vmul.f32 %v804_v18, %v804_v18 }
 0x1b5   : > { %v806_v20 = vsel %vm798_vm0, %v805_v19, 0.0 }
 0x1b6   : > { %807 = vadd.xlane.f32.xlu0 %v806_v20 }
 0x243   : > { %v808_v21 = vpop.xlane.xlu0 %807 }
 0x244   : > { %v809_v22 = vmul.f32 0.03125, %v808_v21 }
 0x246   : > { %v810_v23 = vadd.f32 1e-05, %v809_v22 }
 0x248   : > { %1128 = vrsqrt.f32 %v810_v23 }
 0x252   : > { %v1129_v24 = vpop.eup %1128 }
 0x253   : > { %v812_v26 = vmul.f32 %v1129_v24, %v804_v18 }
 0x255   : > { %v820_v28 = vmul.f32 %v982_v25, %v812_v26 }
 0x257   : > { %v828_v29 = vadd.f32 %v983_v27, %v820_v28 }
 0x259   : > { %829 = vst.msk [vmem:[%s273_s27] sm:$0xf] %vm798_vm0, %v828_v29 }
 0x25a PF: > { %s15_s20 = sadd.s32 1, %s1152_s20   ;;  %s1392_s18 = smov %s1148_s19 }
 0x25b   : > { %p12_p5 = scmp.ge.s32.totalorder %s15_s20, 4   ;;  %s1393_s19 = smov %s1395_s21 }
 0x25d   :  { %14 = sbr.rel (!%p12_p5) target bundleno = 2 (0x2), region = 73 }

// kernel: vpt_clip_forward.13
= control target key start
LH: loop header
LB: loop body
LE: loop exit
PB: predicated region body
PF: predicated region fallthrough
CT: control target
= control target key end

     0   :  { %s719_s18 = smov 0   ;;  %s721_s19 = smov 0   ;;  %s795_s0 = inlined_call_operand.vmem [shape: f32[18,32], index: 0, kind: input, shape index: {}]   ;;  %s796_s1 = inlined_call_operand.vmem [shape: f32[1,32], index: 1, kind: input, shape index: {}]   ;;  %s797_s2 = inlined_call_operand.vmem [shape: f32[1,32], index: 2, kind: input, shape index: {}]   ;;  %s798_s3 = inlined_call_operand.vmem [shape: bf16[12,32,8], index: 3, kind: input, shape index: {}]   ;;  %s799_s4 = inlined_call_operand.vmem [shape: f32[12,1,8], index: 4, kind: input, shape index: {}]   ;;  %s800_s5 = inlined_call_operand.vmem [shape: bf16[12,18,8], index: 5, kind: output, shape index: {}]  }
   0x1   :  { %s723_s20 = smov 0  }
   0x2 LB: > { %s24_s21 = sadd.s32 1, %s683_s19  ;;  %p589_p0 = scmp.ge.s32.totalorder %s687_s20, 1  ;;  %s687_s20 = sphi %s723_s20, %s15_s20   ;;  %s683_s19 = sphi %s721_s19, %s802_s19   ;;  %s679_s18 = sphi %s719_s18, %s801_s18  }
   0x3   : > { %p25_p1 = scmp.ge.s32.totalorder %s24_s21, 12  ;;  %p220_p2 = scmp.lt.s32.totalorder %s687_s20, 13 }
   0x5   : > { %s804_s21 = smov (%p25_p1, %s24_s21), 0  ;;  %p221_p3 = pnand %p589_p0, %p220_p2 }
   0x6   : > { %p266_p4 = scmp.lt.s32.totalorder (!%p221_p3), %s679_s18, 11  ;;  %p593_p5 = scmp.ne.s32.totalorder (!%p221_p3), %s679_s18, 0 }
   0x7   : > { %224 = sbr.rel (%p221_p3) target bundleno = 566 (0x236), region = 40 }
   0xe   : > { %s737_s22 = scalar_select %p266_p4, %s679_s18, 11 }
   0xf   : > { %288 = sbr.rel (%p593_p5) target bundleno = 337 (0x151), region = 44  ;;  %v289_v0 = vld [vmem:[%s795_s0] sm:$0xff] (!%p593_p5)  ;;  %vm292_vm0 = vcmask (!%p593_p5), 261120   ;;  %v291_v1 = vld [vmem:[%s795_s0 + $0x10] sm:$0x3] (!%p593_p5)  ;;  %vm299_vm1 = vcmask (!%p593_p5), 254976  }
  0x10   : > { %s611_s23 = sshll.u32 %s737_s22, 4  ;;  %s273_s26 = scalar_lea.vmem %s799_s4, %s737_s22  ;;  %v290_v2 = vld [vmem:[%s795_s0 + $0x8] sm:$0xff] (!%p593_p5)  ;;  %v293_v3 = vsel (!%p593_p5), %vm292_vm0, %v289_v0, 0.0  ;;  %v300_v4 = vsel (!%p593_p5), %vm299_vm1, %v291_v1, 0.0  ;;  %v594_v31 = vld [vmem:[%s796_s1] ss:$0 sm:$0xff] (!%p593_p5) }
  0x11   : > { %s747_s29 = scalar_lea.vmem %s798_s3, %s611_s23  ;;  %s630_s30 = smul.u32 12, %s737_s22  ;;  %294 = vadd.xlane.f32.xlu0 (!%p593_p5), %v293_v3  ;;  %301 = vadd.xlane.f32.xlu1 (!%p593_p5), %v300_v4  ;;  %v296_v5 = vsel (!%p593_p5), %vm292_vm0, %v290_v2, 0.0  ;;  %v595_v33 = vld [vmem:[%s797_s2] ss:$0 sm:$0xff] (!%p593_p5)  ;;  %vm367_vm2 = vcmask (!%p593_p5), 257024   ;;  %vm370_vm3 = vcmask (!%p593_p5), 253952  }
  0x13   : > { %s753_s8 = scalar_lea.vmem %s800_s5, %s630_s30 }
  0x15   : > { %297 = vadd.xlane.f32.xlu0 (!%p593_p5), %v296_v5 }
  0x9e   : > { %v295_v6 = vpop.xlane.xlu0 %294  ;;  %v302_v7 = vpop.xlane.xlu1 %301 }
  0x9f   : > { %v304_v8 = vmul.f32 0.03125, %v295_v6  ;;  %v306_v9 = vmul.f32 0.03125, %v302_v7 }
  0xa1   : > { %v307_v10 = vsub.f32 %v289_v0, %v304_v8  ;;  %v309_v11 = vsub.f32 %v291_v1, %v306_v9 }
  0xa2   : > { %v298_v12 = vpop.xlane.xlu0 %297 }
  0xa3   : > { %v305_v13 = vmul.f32 0.03125, %v298_v12  ;;  %v310_v14 = vmul.f32 %v307_v10, %v307_v10  ;;  %v312_v15 = vmul.f32 %v309_v11, %v309_v11 }
  0xa5   : > { %v308_v16 = vsub.f32 %v290_v2, %v305_v13  ;;  %v313_v17 = vsel %vm292_vm0, %v310_v14, 0.0  ;;  %v319_v18 = vsel %vm299_vm1, %v312_v15, 0.0 }
  0xa6   : > { %314 = vadd.xlane.f32.xlu1 %v313_v17 }
  0xa7   : > { %v311_v19 = vmul.f32 %v308_v16, %v308_v16 }
  0xa9   : > { %v316_v20 = vsel %vm292_vm0, %v311_v19, 0.0 }
  0xaa   : > { %320 = vadd.xlane.f32.xlu1 %v319_v18  ;;  %317 = vadd.xlane.f32.xlu0 %v316_v20 }
 0x133   : > { %v315_v21 = vpop.xlane.xlu1 %314 }
 0x134   : > { %v322_v22 = vmul.f32 0.03125, %v315_v21 }
 0x136   : > { %v325_v23 = vadd.f32 1e-05, %v322_v22 }
 0x137   : > { %v321_v24 = vpop.xlane.xlu1 %320  ;;  %v318_v25 = vpop.xlane.xlu0 %317 }
 0x138   : > { %655 = vrsqrt.f32 %v325_v23  ;;  %v324_v26 = vmul.f32 0.03125, %v321_v24  ;;  %v323_v27 = vmul.f32 0.03125, %v318_v25 }
 0x13a   : > { %v327_v28 = vadd.f32 1e-05, %v324_v26  ;;  %v326_v29 = vadd.f32 1e-05, %v323_v27 }
 0x13c   : > { %657 = vrsqrt.f32 %v327_v28 }
 0x13d   : > { %659 = vrsqrt.f32 %v326_v29 }
 0x142   : > { %v656_v30 = vpop.eup %655 }
 0x143   : > { %v331_v32 = vmul.f32 %v656_v30, %v307_v10 }
 0x145   : > { %v341_v34 = vmul.f32 %v594_v31, %v331_v32 }
 0x146   : > { %v658_v35 = vpop.eup %657 }
 0x147   : > { %v660_v36 = vpop.eup %659  ;;  %v351_v37 = vadd.f32 %v595_v33, %v341_v34  ;;  %v333_v38 = vmul.f32 %v658_v35, %v309_v11 }
 0x148   : > { %v332_v39 = vmul.f32 %v660_v36, %v308_v16 }
 0x149   : > { %v612_v40 = vpack.c.bf16 %v351_v37, %v351_v37  ;;  %v343_v41 = vmul.f32 %v594_v31, %v333_v38 }
 0x14a   : > { %v342_v42 = vmul.f32 %v594_v31, %v332_v39 }
 0x14b   : > { %368 = vst.msk [vmem:[#allocation2] sm:$0xf] %vm367_vm2, %v612_v40  ;;  %v353_v43 = vadd.f32 %v595_v33, %v343_v41 }
 0x14c   : > { %v352_v44 = vadd.f32 %v595_v33, %v342_v42 }
 0x14d   : > { %v614_v45 = vpack.c.bf16 %v353_v43, %v353_v43 }
 0x14e   : > { %v613_v46 = vpack.c.bf16 %v352_v44, %v352_v44 }
 0x14f   : > { %371 = vst.msk [vmem:[#allocation2 + $0x8] sm:$0x1] %vm370_vm3, %v614_v45 }
 0x150   : > { %369 = vst.msk [vmem:[#allocation2 + $0x4] sm:$0xf] %vm367_vm2, %v613_v46 }
 0x151 PF: > { %v661_v47 = vld [vmem:[%s747_s29] sm:$0xff]   ;;  %v662_v48 = vld [vmem:[%s747_s29 + $0x8] sm:$0xff]   ;;  %vm406_vm4 = vcmask 261120   ;;  %vm477_vm5 = vcmask 57344   ;;  %vm474_vm6 = vcmask 60416  }
 0x152   : > { %622 = vmatprep.subr.bf16.mxu0 %v661_v47  ;;  %v599_v51 = vld [vmem:[%s273_s26] ss:$0 sm:$0xff] }
 0x153   : > { %623 = vmatpush3.bf16.msra.mxu0 %v661_v47 }
 0x154   : > { %624 = vmatprep.subr.bf16.mxu0 %v662_v48 }
 0x156   : > { %v664_v50 = vld [vmem:[#allocation2 + $0x8] ss:$0 sps:$4 sm:$0x11]  }
 0x157   : > { %v663_v49 = vld [vmem:[#allocation2] sm:$0xff]   ;;  %625 = vmatpush3.bf16.msra.mxu0 %v662_v48 }
 0x158   : > { %626 = vmatprep.mubr.msk.bf16.mxu0 %vm406_vm4, %v663_v49 }
 0x15a   : > { %627 = vmatmul.mubr.msk.bf16.vlgmr.msra.gmra.mrb[0].mxu0 %vm406_vm4, %v664_v50 }
 0x22d   : > { %v628_v52 = vpop.f32.mrb[0].mxu0 }
 0x22e   : > { %v456_v53 = vadd.f32 %v628_v52, %v599_v51  ;;  %v447_v54 = vpop.f32.mrb[1].mxu0 }
 0x22f   : > { %v448_v55 = vadd.f32 %v599_v51, %v447_v54  ;;  %v629_v56 = vpop.f32.mrb[2].mxu0 }
 0x230   : > { %v617_v57 = vpack.c.bf16 %v456_v53, %v456_v53  ;;  %v450_v58 = vpop.f32.mrb[3].mxu0 }
 0x231   : > { %v615_v59 = vpack.c.bf16 %v448_v55, %v448_v55  ;;  %v451_v60 = vadd.f32 %v599_v51, %v450_v58 }
 0x232   : > { %478 = vst.msk [vmem:[%s753_s8 + $0x8] sm:$0x1] %vm477_vm5, %v617_v57 }
 0x233   : > { %475 = vst.msk [vmem:[%s753_s8] sm:$0xf] %vm474_vm6, %v615_v59  ;;  %v616_v61 = vpack.c.bf16 %v451_v60, %v451_v60 }
 0x235   : > { %476 = vst.msk [vmem:[%s753_s8 + $0x4] sm:$0xf] %vm474_vm6, %v616_v61 }
 0x236 PF: > { %s15_s20 = sadd.s32 1, %s687_s20   ;;  %s801_s18 = smov %s683_s19 }
 0x237   : > { %p12_p6 = scmp.ge.s32.totalorder %s15_s20, 14   ;;  %s802_s19 = smov %s804_s21 }
 0x239   :  { %14 = sbr.rel (!%p12_p6) target bundleno = 2 (0x2), region = 80 }

// kernel: vpt_clip_forward.14
= control target key start
LH: loop header
LB: loop body
LE: loop exit
PB: predicated region body
PF: predicated region fallthrough
CT: control target
= control target key end

     0   :  { %s1188_s21 = smov 0   ;;  %s1190_s22 = smov 0   ;;  %s1322_s0 = inlined_call_operand.vmem [shape: bf16[12,2,9,8], index: 0, kind: input, shape index: {}, may-alias: {0,1,2}]   ;;  %s1323_s1 = inlined_call_operand.vmem [shape: bf16[12,2,9,8], index: 1, kind: input, shape index: {}, may-alias: {0,1,2}]   ;;  %s1324_s2 = inlined_call_operand.vmem [shape: bf16[12,2,9,8], index: 2, kind: input, shape index: {}, may-alias: {0,1,2}]   ;;  %s1325_s3 = inlined_call_operand.vmem [shape: bf16[4,8,32], index: 3, kind: input, shape index: {}]   ;;  %s1326_s4 = inlined_call_operand.vmem [shape: f32[1,32], index: 4, kind: input, shape index: {}]   ;;  %s1327_s5 = inlined_call_operand.vmem [shape: f32[2,9,32], index: 5, kind: input, shape index: {}]   ;;  %s1328_s6 = inlined_call_operand.vmem [shape: f32[2,9,32], index: 6, kind: output, shape index: {}]  }
   0x1   :  { %1329 = sst [smem:[#allocation7_spill]] %s1322_s0  ;;  %s1192_s23 = smov 0  }
   0x2   :  { %1330 = sst [smem:[#allocation8_spill]] %s1327_s5  ;;  %s1194_s24 = smov 0  }
   0x3   :  { %s1196_s25 = smov 0  }
   0x4 LB: > { %s34_s26 = sadd.s32 1, %s1137_s23  ;;  %s42_s27 = sadd.s32 1, %s1141_s24  ;;  %s1145_s25 = sphi %s1196_s25, %s16_s25   ;;  %s1141_s24 = sphi %s1194_s24, %s1338_s24   ;;  %s1137_s23 = sphi %s1192_s23, %s1337_s23   ;;  %s1133_s22 = sphi %s1190_s22, %s1336_s22   ;;  %s1129_s21 = sphi %s1188_s21, %s1335_s21  }
   0x5   : > { %p36_p0 = scmp.ge.s32.totalorder %s34_s26, 4  ;;  %p990_p1 = scmp.ge.s32.totalorder %s1145_s25, 1 }
   0x6   : > { %p333_p2 = scmp.lt.s32.totalorder %s1145_s25, 9 }
   0x7   : > { %s1340_s26 = smov (%p36_p0, %s34_s26), 0  ;;  %s1342_s27 = smov (!%p36_p0, %s42_s27), %s1141_s24 }
   0x8   : > { %p334_p3 = pnand %p990_p1, %p333_p2  ;;  %p44_p4 = scmp.ge.s32.totalorder %s1342_s27, 2 }
   0x9   : > { %p417_p5 = scmp.lt.s32.totalorder (!%p334_p3), %s1129_s21, 11  ;;  %p419_p6 = scmp.lt.s32.totalorder (!%p334_p3), %s1133_s22, 1 }
   0xa   : > { %s1344_s27 = smov (%p44_p4, %s1342_s27), 0  ;;  %337 = sbr.rel (%p334_p3) target bundleno = 1075 (0x433), region = 44 }
   0xb   : > { %1331 = sst [smem:[#allocation6_spill]] %s1344_s27  ;;  %s430_s28 = sadd.s32 (!%p334_p3), 4, %s1129_s21 }
   0xc   : > { %s446_s29 = sadd.s32 (!%p334_p3), 8, %s1129_s21  ;;  %p432_p7 = scmp.lt.s32.totalorder (!%p334_p3), %s430_s28, 11 }
   0xd   : > { %p448_p8 = scmp.lt.s32.totalorder (!%p334_p3), %s446_s29, 11  ;;  %p462_p9 = scmp.lt.s32.totalorder (!%p334_p3), %s1129_s21, 3 }
   0xe   : > { %s1332_s0 = sld [smem:[#allocation7_spill]] (!%p334_p3)  ;;  %s1333_s5 = sld [smem:[#allocation8_spill]] (!%p334_p3) }
   0xf   : > { %p487_p10 = scmp.eq.s32.totalorder (!%p334_p3), %s1129_s21, 0 }
  0x11   : > { %s418_s30 = scalar_select %p417_p5, %s1129_s21, 11 }
  0x12   : > { %s1346_s22 = smov (!%p419_p6, %s1133_s22), 1  ;;  %s1348_s28 = smov (!%p432_p7, %s430_s28), 11 }
  0x13   : > { %s992_s7 = sshll.u32 %s418_s30, 2  ;;  %s991_s8 = sshll.u32 %s1346_s22, 1  ;;  %vm493_vm0 = vcmask (%p487_p10), 261120   ;;  %vm495_vm1 = vcmask (%p487_p10), 253952   ;;  %v1147_v0 = vmov (%p487_p10), 0.0  }
  0x14   : > { %s426_s9 = sadd.s32 %s992_s7, %s991_s8  ;;  %s1016_s11 = sshll.u32 %s1346_s22, 4  ;;  %494 = vst.msk [vmem:[#allocation5] sm:$0xff] (%p487_p10), %vm493_vm0, %v1147_v0 }
  0x15   : > { %s993_s10 = sshll.u32 %s426_s9, 2  ;;  %s1233_s17 = scalar_lea.vmem %s1333_s5, %s1016_s11  ;;  %496 = vst.msk [vmem:[#allocation5 + $0x8] sm:$0x1] (%p487_p10), %vm495_vm1, %v1147_v0 }
  0x16   : > { %s1228_s14 = scalar_lea.vmem %s1332_s0, %s993_s10  ;;  %s1350_s29 = smov (!%p448_p8, %s446_s29), 11 }
  0x17   : > { %s995_s18 = sshll.u32 %s1348_s28, 2  ;;  %s1238_s30 = scalar_lea.vmem %s1328_s6, %s1016_s11 }
  0x18   : > { %s441_s7 = sadd.s32 %s995_s18, %s991_s8  ;;  %s998_s22 = sshll.u32 %s1350_s29, 2 }
  0x19   : > { %s996_s9 = sshll.u32 %s441_s7, 2  ;;  %s457_s27 = sadd.s32 %s998_s22, %s991_s8 }
  0x1a   : > { %s443_s13 = scalar_lea.vmem %s1323_s1, %s996_s9  ;;  %s999_s0 = sshll.u32 %s457_s27, 2 }
  0x1b   : > { %s1246_s5 = scalar_lea.vmem %s1324_s2, %s999_s0  ;;  %492 = sbr.rel (!%p487_p10) target bundleno = 34 (0x22), region = 48 }
  0x1c   : > { %s463_s28 = scalar_select %p462_p9, %s1129_s21, 3 }
  0x1e   : > { %s1000_s19 = sshll.u32 %s463_s28, 2 }
  0x1f   : > { %s1255_s29 = scalar_lea.vmem %s1325_s3, %s1000_s19 }
  0x22 PF: > { %vm506_vm2 = vcmask 64512   ;;  %v1148_v1 = vmov 0.0   ;;  %v1092_v2 = vld [vmem:[%s443_s13] sm:$0x1f]   ;;  %vm1149_vm3 = vmmov 0   ;;  %vm578_vm4 = vcmask 72704  }
  0x23   : > { %1026 = vmatprep.subr.bf16.mxu0 %v1148_v1  ;;  %507 = vst.msk [vmem:[#allocation4] sm:$0xff] %vm506_vm2, %v1148_v1  ;;  %1032 = vmatprep.subr.bf16.mxu1 %v1148_v1  ;;  %v531_v3 = vsel %vm506_vm2, %v1092_v2, 0  ;;  %v1093_v4 = vld [vmem:[%s1228_s14] sm:$0x1f]   ;;  %vm582_vm5 = vcmask 65536   ;;  %vm500_vm6 = vcmask 7168  }
  0x24   : > { %1028 = vmatprep.mubr.msk.bf16.mxu0 %vm1149_vm3, %v1148_v1  ;;  %1034 = vmatprep.mubr.msk.bf16.mxu1 %vm1149_vm3, %v1148_v1  ;;  %v1150_v13 = vmov -inf   ;;  %504 = vst.msk [vmem:[#allocation3] sm:$0xff] %vm500_vm6, %v1148_v1  ;;  %vm502_vm7 = vcmask 0   ;;  %v1151_v14 = vmov 0   ;;  %vm649_vm8 = vcmask 1043456   ;;  %p782_p11 = scmp.eq.s32.totalorder %s1129_s21, 3 }
  0x25   : > { %1027 = vmatpush3.bf16.xpose.msra.mxu0 %v531_v3  ;;  %501 = vst.msk [vmem:[#allocation2] sm:$0xff] %vm500_vm6, %v1150_v13  ;;  %1090 = vset.pattern.permute.xlu1 %v1151_v14  ;;  %v1094_v23 = vld [vmem:[%s1246_s5] sm:$0x1f]   ;;  %vm650_vm9 = vcmask 1044480   ;;  %v1152_v24 = vmov 65535   ;;  %vm508_vm10 = vcmask 57344  }
  0x26   : > { %503 = vst.msk [vmem:[#allocation2 + $0x8] sm:$0x1] %vm502_vm7, %v1150_v13  ;;  %505 = vst.msk [vmem:[#allocation3 + $0x8] sm:$0x1] %vm502_vm7, %v1148_v1  ;;  %1091 = vset.pattern.permute.xlu0 %v1151_v14  ;;  %v651_v25 = vsel %vm649_vm8, 4294967295, %v1152_v24  ;;  %vm778_vm11 = vcmask 261120  }
  0x27   : > { %v652_v26 = vsel %vm650_vm9, %v651_v25, 0  ;;  %509 = vst.msk [vmem:[#allocation4 + $0x8] sm:$0x1] %vm508_vm10, %v1148_v1  ;;  %v728_v54 = vld [vmem:[%s1255_s29] sm:$0xf]  ;;  %vm780_vm12 = vcmask 253952  }
  0x28   : > { %v654_v27 = vand.u32 %v1094_v23, %v652_v26  ;;  %v733_v55 = vsel %vm649_vm8, %v728_v54, 0  ;;  %v727_v14 = vld [vmem:[#allocation5 + $0x8] sm:$0x1]  ;;  %v799_v25 = vld [vmem:[%s1233_s17 + $0x8] sm:$0x1] (%p782_p11) }
  0x2a   : > { %1033 = vmatpush3.bf16.msra.mxu1 %v654_v27  ;;  %v626_v57 = vld [vmem:[#allocation4] sm:$0xff] }
  0x2b   : > { %1038 = vmatprep.subr.bf16.mxu1 %v1148_v1  ;;  %v610_v43 = vld [vmem:[#allocation3] sm:$0xff] }
  0x2c   : > { %1029 = vmatmul.mubr.msk.bf16.vlgmr.msra.gmra.mrb[0].mxu0 %vm506_vm2, %v1093_v4  ;;  %v576_v15 = vld [vmem:[#allocation2] sm:$0xff] }
  0x2d   : > { %v577_v18 = vld [vmem:[#allocation2 + $0x8] sm:$0x1]  ;;  %v611_v46 = vld [vmem:[#allocation3 + $0x8] sm:$0x1] }
  0x2e   : > { %v627_v59 = vld [vmem:[#allocation4 + $0x8] sm:$0x1] }
  0xff   : > { %v567_v5 = vpop.f32.mrb[0].mxu0 }
 0x100   : > { %v574_v6 = vmul.f32 0.35355338, %v567_v5  ;;  %v1030_v7 = vpop.f32.mrb[1].mxu0 }
 0x101   : > { %v570_v8 = vpop.f32.mrb[2].mxu0 }
 0x102   : > { %v575_v9 = vmul.f32 0.35355338, %v570_v8  ;;  %v1031_v10 = vpop.f32.mrb[3].mxu0  ;;  %v579_v11 = vsel %vm578_vm4, %v574_v6, -inf }
 0x103   : > { %580 = vmax.xlane.f32.xlu0 %v579_v11 }
 0x104   : > { %v583_v12 = vsel %vm582_vm5, %v575_v9, -inf }
 0x107   : > { %584 = vmax.xlane.f32.xlu0 %v583_v12  ;;  %v726_v12 = vld [vmem:[#allocation5] sm:$0xff] }
 0x190   : > { %v581_v16 = vpop.xlane.xlu0 %580 }
 0x191   : > { %v586_v17 = vmax.f32 %v576_v15, %v581_v16 }
 0x193   : > { %v588_v19 = vsub.f32 %v576_v15, %v586_v17  ;;  %702 = vst.msk [vmem:[#allocation2] sm:$0xff] %vm500_vm6, %v586_v17  ;;  %596 = vperm.xlu1 %1090, %v586_v17  }
 0x194   : > { %v585_v20 = vpop.xlane.xlu0 %584 }
 0x195   : > { %v587_v21 = vmax.f32 %v577_v18, %v585_v20  ;;  %v590_v40 = vmul.f32 1.442695, %v588_v19 }
 0x197   : > { %v589_v22 = vsub.f32 %v577_v18, %v587_v21  ;;  %703 = vst.msk [vmem:[#allocation2 + $0x8] sm:$0x1] %vm502_vm7, %v587_v21  ;;  %601 = vperm.xlu1 %1090, %v587_v21   ;;  %v1013_v21 = vld [vmem:[%s1326_s4] ss:$0 sm:$0xff] (%p782_p11) }
 0x199   : > { %v592_v39 = vmul.f32 1.442695, %v589_v22  ;;  %v798_v22 = vld [vmem:[%s1233_s17] sm:$0xff] (%p782_p11) }
 0x212   : > { %v597_v28 = vpop.permute.xlu1 %596 }
 0x213   : > { %v604_v29 = vsub.f32 %v574_v6, %v597_v28 }
 0x215   : > { %v606_v30 = vmul.f32 1.442695, %v604_v29 }
 0x216   : > { %v602_v31 = vpop.permute.xlu1 %601 }
 0x217   : > { %1095 = vpow2.f32 %v606_v30  ;;  %v605_v32 = vsub.f32 %v575_v9, %v602_v31 }
 0x219   : > { %v608_v33 = vmul.f32 1.442695, %v605_v32 }
 0x21b   : > { %1097 = vpow2.f32 %v608_v33 }
 0x21c   : > { %1099 = vpow2.f32 %v592_v39 }
 0x21d   : > { %1101 = vpow2.f32 %v590_v40 }
 0x221   : > { %v1096_v34 = vpop.eup %1095 }
 0x222   : > { %v614_v35 = vsel %vm578_vm4, %v1096_v34, 0.0 }
 0x223   : > { %615 = vadd.xlane.f32.xlu0 %v614_v35 }
 0x225   : > { %v1098_v36 = vpop.eup %1097 }
 0x226   : > { %v617_v37 = vsel %vm582_vm5, %v1098_v36, 0.0  ;;  %v640_v38 = vpack.c.bf16 %v1098_v36, %v1096_v34  ;;  %v1100_v41 = vpop.eup %1099 }
 0x227   : > { %618 = vadd.xlane.f32.xlu1 %v617_v37  ;;  %v1102_v42 = vpop.eup %1101  ;;  %v613_v48 = vmul.f32 %v1100_v41, %v611_v46 }
 0x228   : > { %1035 = vmatmul.mubr.msk.bf16.vlgmr.msra.gmra.mrb[0].mxu1 %vm578_vm4, %v640_v38  ;;  %v612_v44 = vmul.f32 %v1102_v42, %v610_v43 }
 0x229   : > { %1040 = vmatprep.mubr.msk.bf16.mxu1 %vm1149_vm3, %v1148_v1  ;;  %1039 = vmatpush3.bf16.msra.mxu1 %v733_v55 }
 0x238   : > { %635 = vperm.xlu1 %1090, %v1100_v41  }
 0x239   : > { %630 = vperm.xlu0 %1091, %v1102_v42  }
 0x2b0   : > { %v616_v45 = vpop.xlane.xlu0 %615 }
 0x2b1   : > { %v620_v47 = vadd.f32 %v616_v45, %v612_v44 }
 0x2b3   : > { %623 = vst.msk [vmem:[#allocation3] sm:$0xff] %vm500_vm6, %v620_v47 }
 0x2b4   : > { %v619_v49 = vpop.xlane.xlu1 %618 }
 0x2b5   : > { %v621_v50 = vadd.f32 %v619_v49, %v613_v48 }
 0x2b7   : > { %625 = vst.msk [vmem:[#allocation3 + $0x8] sm:$0x1] %vm502_vm7, %v621_v50 }
 0x2b8   : > { %v631_v58 = vpop.permute.xlu0 %630  ;;  %v636_v60 = vpop.permute.xlu1 %635 }
 0x2b9   : > { %v638_v61 = vmul.f32 %v631_v58, %v626_v57  ;;  %v639_v63 = vmul.f32 %v636_v60, %v627_v59 }
 0x2ba   : > { %v707_v51 = vld [vmem:[#allocation3] sm:$0xff] }
 0x2bb   : > { %1103 = vrcp.f32 %v707_v51 }
 0x2be   : > { %v708_v52 = vld [vmem:[#allocation3 + $0x8] sm:$0x1] }
 0x2bf   : > { %1105 = vrcp.f32 %v708_v52 }
 0x2c5   : > { %v1104_v53 = vpop.eup %1103 }
 0x2c6   : > { %715 = vperm.xlu0 %1091, %v1104_v53  }
 0x2c9   : > { %v1106_v56 = vpop.eup %1105 }
 0x2ca   : > { %720 = vperm.xlu0 %1091, %v1106_v56  }
 0x2fb   : > { %v690_v62 = vpop.f32.mrb[0].mxu1 }
 0x2fc   : > { %v697_v0 = vadd.f32 %v690_v62, %v638_v61  ;;  %v1036_v1 = vpop.f32.mrb[1].mxu1 }
 0x2fd   : > { %v693_v2 = vpop.f32.mrb[2].mxu1 }
 0x2fe   : > { %699 = vst.msk [vmem:[#allocation4] sm:$0xff] %vm506_vm2, %v697_v0  ;;  %v698_v3 = vadd.f32 %v693_v2, %v639_v63  ;;  %v1037_v4 = vpop.f32.mrb[3].mxu1 }
 0x300   : > { %701 = vst.msk [vmem:[#allocation4 + $0x8] sm:$0x1] %vm508_vm10, %v698_v3 }
 0x305   : > { %v711_v6 = vld [vmem:[#allocation4] sm:$0xff] }
 0x307   : > { %v712_v7 = vld [vmem:[#allocation4 + $0x8] sm:$0x1] }
 0x345   : > { %v716_v5 = vpop.permute.xlu0 %715 }
 0x346   : > { %v723_v9 = vmul.f32 %v716_v5, %v711_v6 }
 0x349   : > { %v721_v8 = vpop.permute.xlu0 %720 }
 0x34a   : > { %v724_v10 = vmul.f32 %v721_v8, %v712_v7 }
 0x34c   : > { %v725_v11 = vpack.c.bf16 %v724_v10, %v723_v9 }
 0x34e   : > { %1041 = vmatmul.mubr.msk.bf16.vlgmr.msra.gmra.mrb[4].mxu1 %vm506_vm2, %v725_v11 }
 0x420   : > { %786 = sbr.rel (!%p782_p11) target bundleno = 1075 (0x433), region = 60 }
 0x421   : > { %v769_v13 = vpop.f32.mrb[4].mxu1 }
 0x422   : > { %v776_v15 = vadd.f32 %v769_v13, %v726_v12  ;;  %v1042_v16 = vpop.f32.mrb[5].mxu1 }
 0x423   : > { %v772_v17 = vpop.f32.mrb[6].mxu1 }
 0x424   : > { %779 = vst.msk [vmem:[#allocation5] sm:$0xff] %vm778_vm11, %v776_v15  ;;  %v777_v18 = vadd.f32 %v772_v17, %v727_v14  ;;  %v1043_v19 = vpop.f32.mrb[7].mxu1 }
 0x426   : > { %781 = vst.msk [vmem:[#allocation5 + $0x8] sm:$0x1] %vm780_vm12, %v777_v18 }
 0x42b   : > { %v787_v20 = vld [vmem:[#allocation5] sm:$0xff] }
 0x42c   : > { %v796_v23 = vadd.f32 %v1013_v21, %v787_v20 }
 0x42d   : > { %v788_v24 = vld [vmem:[#allocation5 + $0x8] sm:$0x1] }
 0x42e   : > { %v797_v26 = vadd.f32 %v1013_v21, %v788_v24  ;;  %v800_v27 = vadd.f32 %v798_v22, %v796_v23 }
 0x430   : > { %v801_v28 = vadd.f32 %v799_v25, %v797_v26  ;;  %803 = vst.msk [vmem:[%s1238_s30] sm:$0xff] %vm778_vm11, %v800_v27 }
 0x432   : > { %805 = vst.msk [vmem:[%s1238_s30 + $0x8] sm:$0x1] %vm780_vm12, %v801_v28 }
 0x433 PF: > { %s16_s25 = sadd.s32 1, %s1145_s25   ;;  %s1334_s27 = sld [smem:[#allocation6_spill]] }
 0x434   : > { %p13_p12 = scmp.ge.s32.totalorder %s16_s25, 10   ;;  %s1335_s21 = smov %s1137_s23 }
 0x435   : > { %s1336_s22 = smov %s1141_s24  ;;  %s1337_s23 = smov %s1340_s26 }
 0x436   :  { %15 = sbr.rel (!%p13_p12) target bundleno = 4 (0x4), region = 102 }
 0x439   : > { %s1338_s24 = smov %s1334_s27 }

// kernel: vpt_clip_forward.15
= control target key start
LH: loop header
LB: loop body
LE: loop exit
PB: predicated region body
PF: predicated region fallthrough
CT: control target
= control target key end

     0   :  { %vm34_vm0 = vcmask 261120   ;;  %vm41_vm1 = vcmask 254976   ;;  %vm109_vm2 = vcmask 257024   ;;  %vm112_vm3 = vcmask 253952   ;;  %s614_s0 = inlined_call_operand.vmem [shape: f32[18,32], index: 0, kind: input, shape index: {}]   ;;  %s615_s3 = inlined_call_operand.vmem [shape: bf16[1,32,128], index: 3, kind: input, shape index: {}]   ;;  %s616_s1 = inlined_call_operand.vmem [shape: f32[1,32], index: 1, kind: input, shape index: {}]   ;;  %s617_s2 = inlined_call_operand.vmem [shape: f32[1,32], index: 2, kind: input, shape index: {}]   ;;  %s618_s5 = inlined_call_operand.vmem [shape: bf16[1,128,32], index: 5, kind: input, shape index: {}]   ;;  %s619_s4 = inlined_call_operand.vmem [shape: f32[1,1,128], index: 4, kind: input, shape index: {}]   ;;  %s620_s6 = inlined_call_operand.vmem [shape: f32[1,32], index: 6, kind: input, shape index: {}]   ;;  %s621_s7 = inlined_call_operand.vmem [shape: f32[18,32], index: 7, kind: output, shape index: {}]  }
   0x1   :  { %v527_v0 = vld [vmem:[%s614_s0] sm:$0xff]  ;;  %v532_v1 = vld [vmem:[%s614_s0 + $0x8] sm:$0xff]  ;;  %v33_v3 = vld [vmem:[%s614_s0 + $0x10] sm:$0x3]  ;;  %v483_v59 = vmov 0.0  }
   0x2   :  { %v35_v2 = vsel %vm34_vm0, %v527_v0, 0.0  ;;  %v42_v4 = vsel %vm41_vm1, %v33_v3, 0.0  ;;  %v38_v5 = vsel %vm34_vm0, %v532_v1, 0.0  ;;  %v453_v21 = vld [vmem:[%s615_s3] sm:$0xff]   ;;  %v454_v22 = vld [vmem:[%s615_s3 + $0x8] sm:$0xff]   ;;  %v459_v53 = vld [vmem:[%s618_s5 + $0x10] sm:$0xff]  }
   0x3   :  { %36 = vadd.xlane.f32.xlu0 %v35_v2  ;;  %43 = vadd.xlane.f32.xlu1 %v42_v4  ;;  %v383_v33 = vld [vmem:[%s616_s1] ss:$0 sm:$0xff]  ;;  %v458_v52 = vld [vmem:[%s618_s5 + $0x8] sm:$0xff]   ;;  %v460_v54 = vld [vmem:[%s618_s5 + $0x18] sm:$0xff]   ;;  %116 = vst.msk [vmem:[#allocation3 + $0x10] sm:$0x3] %vm41_vm1, %v483_v59 }
   0x4   :  { %424 = vmatprep.subr.bf16.mxu0 %v453_v21  ;;  %v384_v35 = vld [vmem:[%s617_s2] ss:$0 sm:$0xff]  ;;  %v462_v56 = vld [vmem:[%s618_s5 + $0x28] sm:$0xff]   ;;  %v463_v57 = vld [vmem:[%s618_s5 + $0x30] sm:$0xff]   ;;  %114 = vst.msk [vmem:[#allocation3] sm:$0xff] %vm34_vm0, %v483_v59 }
   0x5   :  { %425 = vmatpush3.bf16.msra.mxu0 %v453_v21  ;;  %v457_v51 = vld [vmem:[%s618_s5] sm:$0xff]   ;;  %v464_v58 = vld [vmem:[%s618_s5 + $0x38] sm:$0xff]   ;;  %115 = vst.msk [vmem:[#allocation3 + $0x8] sm:$0xff] %vm34_vm0, %v483_v59 }
   0x6   :  { %426 = vmatprep.subr.bf16.mxu0 %v454_v22  ;;  %432 = vmatprep.subr.bf16.mxu1 %v457_v51  ;;  %v461_v55 = vld [vmem:[%s618_s5 + $0x20] sm:$0xff]  }
   0x7   :  { %39 = vadd.xlane.f32.xlu0 %v38_v5  ;;  %433 = vmatpush3.bf16.msra.mxu1 %v457_v51  ;;  %v388_v60 = vld [vmem:[%s619_s4] ss:$0 sm:$0xff] }
   0x8   :  { %434 = vmatprep.subr.bf16.mxu1 %v458_v52 }
   0x9   :  { %427 = vmatpush3.bf16.msra.mxu0 %v454_v22 }
   0xb   :  { %435 = vmatpush3.bf16.msra.mxu1 %v458_v52 }
   0xc   :  { %436 = vmatprep.subr.bf16.mxu1 %v459_v53 }
   0xf   :  { %437 = vmatpush3.bf16.msra.mxu1 %v459_v53 }
  0x10   :  { %438 = vmatprep.subr.bf16.mxu1 %v460_v54 }
  0x13   :  { %439 = vmatpush3.bf16.msra.mxu1 %v460_v54 }
  0x14   :  { %440 = vmatprep.subr.bf16.mxu1 %v461_v55 }
  0x17   :  { %441 = vmatpush3.bf16.msra.mxu1 %v461_v55 }
  0x18   :  { %442 = vmatprep.subr.bf16.mxu1 %v462_v56 }
  0x1b   :  { %443 = vmatpush3.bf16.msra.mxu1 %v462_v56 }
  0x1c   :  { %444 = vmatprep.subr.bf16.mxu1 %v463_v57 }
  0x1f   :  { %445 = vmatpush3.bf16.msra.mxu1 %v463_v57 }
  0x20   :  { %446 = vmatprep.subr.bf16.mxu1 %v464_v58 }
  0x23   :  { %447 = vmatpush3.bf16.msra.mxu1 %v464_v58 }
  0x90   :  { %v37_v6 = vpop.xlane.xlu0 %36  ;;  %v44_v8 = vpop.xlane.xlu1 %43 }
  0x91   :  { %v46_v7 = vmul.f32 0.03125, %v37_v6  ;;  %v48_v9 = vmul.f32 0.03125, %v44_v8 }
  0x93   :  { %v49_v10 = vsub.f32 %v527_v0, %v46_v7  ;;  %v51_v11 = vsub.f32 %v33_v3, %v48_v9 }
  0x94   :  { %v40_v12 = vpop.xlane.xlu0 %39 }
  0x95   :  { %v47_v13 = vmul.f32 0.03125, %v40_v12  ;;  %v52_v14 = vmul.f32 %v49_v10, %v49_v10  ;;  %v54_v15 = vmul.f32 %v51_v11, %v51_v11 }
  0x97   :  { %v50_v16 = vsub.f32 %v532_v1, %v47_v13  ;;  %v55_v17 = vsel %vm34_vm0, %v52_v14, 0.0  ;;  %v61_v18 = vsel %vm41_vm1, %v54_v15, 0.0 }
  0x98   :  { %56 = vadd.xlane.f32.xlu1 %v55_v17 }
  0x99   :  { %v53_v19 = vmul.f32 %v50_v16, %v50_v16 }
  0x9b   :  { %v58_v20 = vsel %vm34_vm0, %v53_v19, 0.0 }
  0x9c   :  { %62 = vadd.xlane.f32.xlu1 %v61_v18  ;;  %59 = vadd.xlane.f32.xlu0 %v58_v20 }
 0x125   :  { %v57_v23 = vpop.xlane.xlu1 %56 }
 0x126   :  { %v64_v24 = vmul.f32 0.03125, %v57_v23 }
 0x128   :  { %v67_v25 = vadd.f32 1e-05, %v64_v24 }
 0x129   :  { %v63_v26 = vpop.xlane.xlu1 %62  ;;  %v60_v27 = vpop.xlane.xlu0 %59 }
 0x12a   :  { %465 = vrsqrt.f32 %v67_v25  ;;  %v66_v28 = vmul.f32 0.03125, %v63_v26  ;;  %v65_v29 = vmul.f32 0.03125, %v60_v27  ;;  %v232_v26 = vld [vmem:[#allocation3 + $0x10] sm:$0x3]  ;;  %v230_v27 = vld [vmem:[#allocation3] sm:$0xff] }
 0x12c   :  { %v69_v30 = vadd.f32 1e-05, %v66_v28  ;;  %v68_v31 = vadd.f32 1e-05, %v65_v29 }
 0x12e   :  { %467 = vrsqrt.f32 %v69_v30 }
 0x12f   :  { %469 = vrsqrt.f32 %v68_v31  ;;  %v231_v31 = vld [vmem:[#allocation3 + $0x8] sm:$0xff] }
 0x134   :  { %v466_v32 = vpop.eup %465 }
 0x135   :  { %v73_v34 = vmul.f32 %v466_v32, %v49_v10 }
 0x137   :  { %v83_v36 = vmul.f32 %v383_v33, %v73_v34 }
 0x138   :  { %v468_v37 = vpop.eup %467 }
 0x139   :  { %v470_v38 = vpop.eup %469  ;;  %v93_v39 = vadd.f32 %v384_v35, %v83_v36  ;;  %v75_v40 = vmul.f32 %v468_v37, %v51_v11  ;;  %v406_v36 = vld [vmem:[%s620_s6] ss:$0 sm:$0xff]  ;;  %v372_v37 = vld [vmem:[%s614_s0 + $0x10] sm:$0x3] }
 0x13a   :  { %v74_v41 = vmul.f32 %v470_v38, %v50_v16 }
 0x13b   :  { %v407_v42 = vpack.c.bf16 %v93_v39, %v93_v39  ;;  %v85_v43 = vmul.f32 %v383_v33, %v75_v40 }
 0x13c   :  { %v84_v44 = vmul.f32 %v383_v33, %v74_v41 }
 0x13d   :  { %110 = vst.msk [vmem:[#allocation2] sm:$0xf] %vm109_vm2, %v407_v42  ;;  %v95_v45 = vadd.f32 %v384_v35, %v85_v43 }
 0x13e   :  { %v94_v46 = vadd.f32 %v384_v35, %v84_v44 }
 0x13f   :  { %v409_v47 = vpack.c.bf16 %v95_v45, %v95_v45 }
 0x140   :  { %v408_v48 = vpack.c.bf16 %v94_v46, %v94_v46 }
 0x141   :  { %113 = vst.msk [vmem:[#allocation2 + $0x8] sm:$0x1] %vm112_vm3, %v409_v47 }
 0x142   :  { %111 = vst.msk [vmem:[#allocation2 + $0x4] sm:$0xf] %vm109_vm2, %v408_v48 }
 0x148   :  { %v456_v49 = vld [vmem:[#allocation2 + $0x8] ss:$0 sps:$4 sm:$0x11]  }
 0x149   :  { %v455_v50 = vld [vmem:[#allocation2] sm:$0xff]  }
 0x14a   :  { %428 = vmatprep.mubr.msk.bf16.mxu0 %vm34_vm0, %v455_v50 }
 0x14b   :  { %429 = vmatmul.mubr.msk.bf16.vlgmr.msra.gmra.mrb[0].mxu0 %vm34_vm0, %v456_v49 }
 0x21e   :  { %v430_v61 = vpop.f32.mrb[0].mxu0 }
 0x21f   :  { %v201_v62 = vadd.f32 %v430_v61, %v388_v60  ;;  %v192_v63 = vpop.f32.mrb[1].mxu0 }
 0x220   :  { %v193_v2 = vadd.f32 %v388_v60, %v192_v63  ;;  %v431_v3 = vpop.f32.mrb[2].mxu0 }
 0x221   :  { %v397_v4 = vmul.f32 -1.702, %v201_v62  ;;  %v195_v5 = vpop.f32.mrb[3].mxu0 }
 0x222   :  { %v395_v6 = vmul.f32 -1.702, %v193_v2  ;;  %v196_v7 = vadd.f32 %v388_v60, %v195_v5 }
 0x223   :  { %v216_v8 = vmul.f32 1.442695, %v397_v4 }
 0x224   :  { %v212_v9 = vmul.f32 1.442695, %v395_v6  ;;  %v396_v10 = vmul.f32 -1.702, %v196_v7 }
 0x225   :  { %471 = vpow2.f32 %v216_v8 }
 0x226   :  { %473 = vpow2.f32 %v212_v9  ;;  %v214_v11 = vmul.f32 1.442695, %v396_v10 }
 0x228   :  { %475 = vpow2.f32 %v214_v11 }
 0x22f   :  { %v472_v12 = vpop.eup %471 }
 0x230   :  { %v474_v13 = vpop.eup %473  ;;  %v220_v14 = vadd.f32 1.0, %v472_v12 }
 0x231   :  { %v218_v15 = vadd.f32 1.0, %v474_v13 }
 0x232   :  { %v476_v16 = vpop.eup %475  ;;  %477 = vrcp.f32 %v220_v14 }
 0x233   :  { %479 = vrcp.f32 %v218_v15  ;;  %v219_v17 = vadd.f32 1.0, %v476_v16 }
 0x235   :  { %481 = vrcp.f32 %v219_v17 }
 0x23c   :  { %v478_v18 = vpop.eup %477 }
 0x23d   :  { %v480_v19 = vpop.eup %479  ;;  %v229_v21 = vmul.f32 %v478_v18, %v201_v62 }
 0x23e   :  { %v227_v22 = vmul.f32 %v480_v19, %v193_v2 }
 0x23f   :  { %v482_v20 = vpop.eup %481  ;;  %v234_v25 = vpack.c.bf16 %v229_v21, %v229_v21 }
 0x240   :  { %v228_v23 = vmul.f32 %v482_v20, %v196_v7 }
 0x242   :  { %v233_v24 = vpack.c.bf16 %v228_v23, %v227_v22 }
 0x244   :  { %448 = vmatprep.mubr.bf16.mxu1 %v233_v24 }
 0x245   :  { %449 = vmatmul.mubr.bf16.vlgmr.msra.gmra.mrb[0].mxu1 %v234_v25 }
 0x318   :  { %v450_v28 = vpop.f32.mrb[0].mxu1 }
 0x319   :  { %v349_v29 = vadd.f32 %v450_v28, %v232_v26  ;;  %v333_v30 = vpop.f32.mrb[1].mxu1 }
 0x31a   :  { %v347_v32 = vadd.f32 %v333_v30, %v230_v27  ;;  %v451_v33 = vpop.f32.mrb[2].mxu1 }
 0x31b   :  { %353 = vst.msk [vmem:[#allocation3 + $0x10] sm:$0x3] %vm41_vm1, %v349_v29  ;;  %v336_v34 = vpop.f32.mrb[3].mxu1 }
 0x31c   :  { %350 = vst.msk [vmem:[#allocation3] sm:$0xff] %vm34_vm0, %v347_v32  ;;  %v348_v35 = vadd.f32 %v336_v34, %v231_v31 }
 0x31e   :  { %351 = vst.msk [vmem:[#allocation3 + $0x8] sm:$0xff] %vm34_vm0, %v348_v35 }
 0x322   :  { %v359_v38 = vld [vmem:[#allocation3 + $0x10] sm:$0x3] }
 0x323   :  { %v369_v39 = vadd.f32 %v406_v36, %v359_v38  ;;  %v357_v40 = vld [vmem:[#allocation3] sm:$0xff] }
 0x324   :  { %v367_v41 = vadd.f32 %v406_v36, %v357_v40 }
 0x325   :  { %v375_v42 = vadd.f32 %v372_v37, %v369_v39  ;;  %v358_v43 = vld [vmem:[#allocation3 + $0x8] sm:$0xff] }
 0x326   :  { %v373_v44 = vadd.f32 %v367_v41, %v527_v0  ;;  %v368_v45 = vadd.f32 %v406_v36, %v358_v43 }
 0x327   :  { %378 = vst.msk [vmem:[%s621_s7 + $0x10] sm:$0x3] %vm41_vm1, %v375_v42 }
 0x328   :  { %376 = vst.msk [vmem:[%s621_s7] sm:$0xff] %vm34_vm0, %v373_v44  ;;  %v374_v46 = vadd.f32 %v532_v1, %v368_v45 }
 0x32a   :  { %377 = vst.msk [vmem:[%s621_s7 + $0x8] sm:$0xff] %vm34_vm0, %v374_v46 }

// kernel: vpt_clip_forward.16
= control target key start
LH: loop header
LB: loop body
LE: loop exit
PB: predicated region body
PF: predicated region fallthrough
CT: control target
= control target key end

     0   :  { %vm11_vm0 = vcmask 261120   ;;  %s85_s0 = inlined_call_operand.vmem [shape: f32[8,32], index: 0, kind: input, shape index: {}]   ;;  %s86_s1 = inlined_call_operand.hbm [shape: f32[8,32], index: 1, kind: output, shape index: {}]  }
   0x1   :  { %v9_v0 = vld [vmem:[%s85_s0] sm:$0xff] }
   0x2   :  { %6 = vsyncpa [#allocation3], 0  ;;  %v10_v1 = vmul.f32 %v9_v0, %v9_v0  ;;  %s59_s8 = smov [#allocation2]  }
   0x3   :  { %s24_s9 = sshll.u32 %s59_s8, 4  ;;  %s25_s9 = int_to_ptr.vmem [resolvable:$true] %s24_s9 }
   0x4   :  { %v12_v2 = vsel %vm11_vm0, %v10_v1, 0.0  ;;  %s35_s10 = scalar_lea.vmem %s25_s9, 128  ;;  %p40_p1 = scmp.lt.s32.totalorder %s25_s9, %s25_s9 }
   0x5   :  { %13 = vadd.xlane.f32.xlu0 %v12_v2  ;;  %p36_p0 = scmp.ne.s32.totalorder %s25_s9, %s35_s10  ;;  %p41_p2 = scmp.lt.s32.totalorder %s35_s10, %s35_s10 }
   0x7   :  { %p42_p3 = por %p41_p2, %p40_p1 }
   0x9   :  { %p43_p4 = pnand %p42_p3, %p36_p0 }
  0x92   :  { %v14_v3 = vpop.xlane.xlu0 %13 }
  0x93   :  { %33 = vrsqrt.f32 %v14_v3 }
  0x9d   :  { %v34_v4 = vpop.eup %33 }
  0x9e   :  { %v16_v5 = vmul.f32 %v34_v4, %v9_v0 }
  0xa0   :  { %17 = vst.msk [vmem:[#allocation2] sm:$0xff] %vm11_vm0, %v16_v5 }
  0xa1   :  { %46 = shalt.err (!%p43_p4)
}
  0xa2   :  { %s47_s12 = scalar_lea.hbm %s86_s1, 128 }
  0xa3   :  { %p48_p5 = scmp.ne.s32.totalorder %s86_s1, %s47_s12  ;;  %p51_p6 = scmp.lt.u32.totalorder %s47_s12, %s86_s1 }
  0xa5   :  { %p53_p7 = pnand %p51_p6, %p48_p5 }
  0xa7   :  { %56 = shalt.err (!%p53_p7)
}
  0xa8   :  { %27 = dma.vmem_to_hbm [thread:$0]  %s25_s9, 128, %s86_s1, [#allocation3]  }
  0xa9   :  { %57 = dma.done.wait [#allocation3], 128  }
  0xaa   :  { %58 = vsyncadd [#allocation3], 4294967168 }
  0xab   :  { %31 = vsyncpa [#allocation3], 1 }

// kernel: vpt_clip_forward.20
= control target key start
LH: loop header
LB: loop body
LE: loop exit
PB: predicated region body
PF: predicated region fallthrough
CT: control target
= control target key end

     0   :  { %vm29_vm0 = vcmask 261120   ;;  %vm36_vm1 = vcmask 254976   ;;  %vm223_vm2 = vcmask 123904   ;;  %vm220_vm3 = vcmask 130048   ;;  %s348_s0 = inlined_call_operand.vmem [shape: f32[18,32], index: 0, kind: input, shape index: {}]   ;;  %s349_s1 = inlined_call_operand.vmem [shape: f32[1,32], index: 1, kind: input, shape index: {}]   ;;  %s350_s2 = inlined_call_operand.vmem [shape: f32[1,32], index: 2, kind: input, shape index: {}]   ;;  %s351_s5 = inlined_call_operand.vmem [shape: bf16[32,16], index: 5, kind: input, shape index: {}]   ;;  %s352_s3 = inlined_call_operand.vmem [shape: f32[1,32], index: 3, kind: input, shape index: {}]   ;;  %s353_s4 = inlined_call_operand.vmem [shape: f32[1,32], index: 4, kind: input, shape index: {}]   ;;  %s354_s6 = inlined_call_operand.vmem [shape: f32[18,16], index: 6, kind: output, shape index: {}]  }
   0x1   :  { %v24_v0 = vld [vmem:[%s348_s0] sm:$0xff]  ;;  %v26_v1 = vld [vmem:[%s348_s0 + $0x10] sm:$0x3]  ;;  %v25_v2 = vld [vmem:[%s348_s0 + $0x8] sm:$0xff] }
   0x2   :  { %v30_v3 = vsel %vm29_vm0, %v24_v0, 0.0  ;;  %v37_v4 = vsel %vm36_vm1, %v26_v1, 0.0  ;;  %v33_v5 = vsel %vm29_vm0, %v25_v2, 0.0  ;;  %v229_v31 = vld [vmem:[%s349_s1] ss:$0 sm:$0xff]  ;;  %v250_v63 = vld [vmem:[%s351_s5 + $0x8] sm:$0xff]  }
   0x3   :  { %31 = vadd.xlane.f32.xlu0 %v30_v3  ;;  %38 = vadd.xlane.f32.xlu1 %v37_v4  ;;  %v230_v33 = vld [vmem:[%s350_s2] ss:$0 sm:$0xff] }
   0x4   :  { %v249_v62 = vld [vmem:[%s351_s5] sm:$0xff]  }
   0x5   :  { %241 = vmatprep.subr.bf16.mxu0 %v249_v62 }
   0x6   :  { %242 = vmatpush3.bf16.msra.mxu0 %v249_v62 }
   0x7   :  { %34 = vadd.xlane.f32.xlu0 %v33_v5  ;;  %243 = vmatprep.subr.bf16.mxu0 %v250_v63 }
   0xa   :  { %244 = vmatpush3.bf16.msra.mxu0 %v250_v63 }
  0x90   :  { %v32_v6 = vpop.xlane.xlu0 %31  ;;  %v39_v7 = vpop.xlane.xlu1 %38 }
  0x91   :  { %v41_v8 = vmul.f32 0.03125, %v32_v6  ;;  %v43_v9 = vmul.f32 0.03125, %v39_v7 }
  0x93   :  { %v44_v10 = vsub.f32 %v24_v0, %v41_v8  ;;  %v46_v11 = vsub.f32 %v26_v1, %v43_v9 }
  0x94   :  { %v35_v12 = vpop.xlane.xlu0 %34 }
  0x95   :  { %v42_v13 = vmul.f32 0.03125, %v35_v12  ;;  %v47_v14 = vmul.f32 %v44_v10, %v44_v10  ;;  %v49_v15 = vmul.f32 %v46_v11, %v46_v11 }
  0x97   :  { %v45_v16 = vsub.f32 %v25_v2, %v42_v13  ;;  %v50_v17 = vsel %vm29_vm0, %v47_v14, 0.0  ;;  %v56_v18 = vsel %vm36_vm1, %v49_v15, 0.0 }
  0x98   :  { %51 = vadd.xlane.f32.xlu1 %v50_v17  ;;  %v232_v17 = vld [vmem:[%s353_s4] ss:$0 sm:$0xff] }
  0x99   :  { %v48_v19 = vmul.f32 %v45_v16, %v45_v16 }
  0x9b   :  { %v53_v20 = vsel %vm29_vm0, %v48_v19, 0.0 }
  0x9c   :  { %57 = vadd.xlane.f32.xlu1 %v56_v18  ;;  %54 = vadd.xlane.f32.xlu0 %v53_v20 }
 0x125   :  { %v52_v21 = vpop.xlane.xlu1 %51 }
 0x126   :  { %v59_v22 = vmul.f32 0.03125, %v52_v21 }
 0x128   :  { %v62_v23 = vadd.f32 1e-06, %v59_v22 }
 0x129   :  { %v58_v24 = vpop.xlane.xlu1 %57  ;;  %v55_v25 = vpop.xlane.xlu0 %54 }
 0x12a   :  { %251 = vrsqrt.f32 %v62_v23  ;;  %v61_v26 = vmul.f32 0.03125, %v58_v24  ;;  %v60_v27 = vmul.f32 0.03125, %v55_v25 }
 0x12c   :  { %v64_v28 = vadd.f32 1e-06, %v61_v26  ;;  %v63_v29 = vadd.f32 1e-06, %v60_v27 }
 0x12e   :  { %253 = vrsqrt.f32 %v64_v28 }
 0x12f   :  { %255 = vrsqrt.f32 %v63_v29 }
 0x134   :  { %v252_v30 = vpop.eup %251 }
 0x135   :  { %v68_v32 = vmul.f32 %v252_v30, %v44_v10 }
 0x137   :  { %v77_v34 = vmul.f32 %v229_v31, %v68_v32 }
 0x138   :  { %v254_v35 = vpop.eup %253 }
 0x139   :  { %v256_v36 = vpop.eup %255  ;;  %v86_v37 = vadd.f32 %v230_v33, %v77_v34  ;;  %v70_v38 = vmul.f32 %v254_v35, %v46_v11  ;;  %v231_v11 = vld [vmem:[%s352_s3] ss:$0 sm:$0xff] }
 0x13a   :  { %v69_v39 = vmul.f32 %v256_v36, %v45_v16 }
 0x13b   :  { %v91_v40 = vsel %vm29_vm0, %v86_v37, 0.0  ;;  %v79_v41 = vmul.f32 %v229_v31, %v70_v38 }
 0x13c   :  { %92 = vadd.xlane.f32.xlu0 %v91_v40  ;;  %v78_v42 = vmul.f32 %v229_v31, %v69_v39 }
 0x13d   :  { %v88_v43 = vadd.f32 %v230_v33, %v79_v41 }
 0x13e   :  { %v87_v44 = vadd.f32 %v230_v33, %v78_v42 }
 0x13f   :  { %v97_v45 = vsel %vm36_vm1, %v88_v43, 0.0 }
 0x140   :  { %98 = vadd.xlane.f32.xlu0 %v97_v45  ;;  %v94_v46 = vsel %vm29_vm0, %v87_v44, 0.0 }
 0x141   :  { %95 = vadd.xlane.f32.xlu1 %v94_v46 }
 0x1c9   :  { %v93_v47 = vpop.xlane.xlu0 %92 }
 0x1ca   :  { %v100_v48 = vmul.f32 0.03125, %v93_v47 }
 0x1cc   :  { %v103_v49 = vsub.f32 %v86_v37, %v100_v48 }
 0x1cd   :  { %v99_v50 = vpop.xlane.xlu0 %98 }
 0x1ce   :  { %v96_v51 = vpop.xlane.xlu1 %95  ;;  %v102_v52 = vmul.f32 0.03125, %v99_v50  ;;  %v106_v53 = vmul.f32 %v103_v49, %v103_v49 }
 0x1cf   :  { %v101_v54 = vmul.f32 0.03125, %v96_v51 }
 0x1d0   :  { %v105_v55 = vsub.f32 %v88_v43, %v102_v52  ;;  %v109_v56 = vsel %vm29_vm0, %v106_v53, 0.0 }
 0x1d1   :  { %v104_v57 = vsub.f32 %v87_v44, %v101_v54  ;;  %110 = vadd.xlane.f32.xlu1 %v109_v56 }
 0x1d2   :  { %v108_v58 = vmul.f32 %v105_v55, %v105_v55 }
 0x1d3   :  { %v107_v59 = vmul.f32 %v104_v57, %v104_v57 }
 0x1d4   :  { %v115_v60 = vsel %vm36_vm1, %v108_v58, 0.0 }
 0x1d5   :  { %v112_v61 = vsel %vm29_vm0, %v107_v59, 0.0  ;;  %116 = vadd.xlane.f32.xlu1 %v115_v60 }
 0x1d6   :  { %113 = vadd.xlane.f32.xlu0 %v112_v61 }
 0x25e   :  { %v111_v0 = vpop.xlane.xlu1 %110 }
 0x25f   :  { %v118_v1 = vmul.f32 0.03125, %v111_v0 }
 0x261   :  { %v121_v2 = vadd.f32 1e-05, %v118_v1 }
 0x262   :  { %v117_v3 = vpop.xlane.xlu1 %116 }
 0x263   :  { %257 = vrsqrt.f32 %v121_v2  ;;  %v120_v4 = vmul.f32 0.03125, %v117_v3  ;;  %v114_v5 = vpop.xlane.xlu0 %113 }
 0x264   :  { %v119_v6 = vmul.f32 0.03125, %v114_v5 }
 0x265   :  { %v123_v7 = vadd.f32 1e-05, %v120_v4 }
 0x266   :  { %v122_v8 = vadd.f32 1e-05, %v119_v6 }
 0x267   :  { %259 = vrsqrt.f32 %v123_v7 }
 0x268   :  { %261 = vrsqrt.f32 %v122_v8 }
 0x26d   :  { %v258_v9 = vpop.eup %257 }
 0x26e   :  { %v127_v10 = vmul.f32 %v258_v9, %v103_v49 }
 0x270   :  { %v136_v16 = vmul.f32 %v231_v11, %v127_v10 }
 0x271   :  { %v260_v12 = vpop.eup %259 }
 0x272   :  { %v262_v13 = vpop.eup %261  ;;  %v129_v14 = vmul.f32 %v260_v12, %v105_v55  ;;  %v145_v21 = vadd.f32 %v232_v17, %v136_v16 }
 0x273   :  { %v128_v15 = vmul.f32 %v262_v13, %v104_v57 }
 0x274   :  { %v138_v18 = vmul.f32 %v231_v11, %v129_v14 }
 0x275   :  { %v137_v19 = vmul.f32 %v231_v11, %v128_v15 }
 0x276   :  { %v147_v20 = vadd.f32 %v232_v17, %v138_v18 }
 0x277   :  { %v146_v22 = vadd.f32 %v232_v17, %v137_v19 }
 0x278   :  { %v149_v23 = vpack.c.bf16 %v147_v20, %v147_v20 }
 0x279   :  { %v148_v24 = vpack.c.bf16 %v146_v22, %v145_v21 }
 0x27b   :  { %245 = vmatprep.mubr.msk.bf16.mxu0 %vm29_vm0, %v148_v24 }
 0x27c   :  { %246 = vmatmul.mubr.msk.bf16.vlgmr.msra.gmra.mrb[0].mxu0 %vm29_vm0, %v149_v23 }
 0x34f   :  { %v247_v25 = vpop.f32.mrb[0].mxu0 }
 0x350   :  { %224 = vst.msk [vmem:[%s354_s6 + $0x10] sm:$0x3] %vm223_vm2, %v247_v25  ;;  %v206_v26 = vpop.f32.mrb[1].mxu0 }
 0x351   :  { %221 = vst.msk [vmem:[%s354_s6] sm:$0xff] %vm220_vm3, %v206_v26  ;;  %v248_v27 = vpop.f32.mrb[2].mxu0 }
 0x352   :  { %v209_v28 = vpop.f32.mrb[3].mxu0 }
 0x353   :  { %222 = vst.msk [vmem:[%s354_s6 + $0x8] sm:$0xff] %vm220_vm3, %v209_v28 }

// kernel: vpt_clip_forward.21
= control target key start
LH: loop header
LB: loop body
LE: loop exit
PB: predicated region body
PF: predicated region fallthrough
CT: control target
= control target key end

     0   :  { %vm11_vm0 = vcmask 130048   ;;  %s85_s0 = inlined_call_operand.vmem [shape: f32[8,16], index: 0, kind: input, shape index: {}]   ;;  %s86_s1 = inlined_call_operand.hbm [shape: f32[8,16], index: 1, kind: output, shape index: {}]  }
   0x1   :  { %v9_v0 = vld [vmem:[%s85_s0] sm:$0xff] }
   0x2   :  { %6 = vsyncpa [#allocation3], 0  ;;  %v10_v1 = vmul.f32 %v9_v0, %v9_v0  ;;  %s59_s8 = smov [#allocation2]  }
   0x3   :  { %s24_s9 = sshll.u32 %s59_s8, 4  ;;  %s25_s9 = int_to_ptr.vmem [resolvable:$true] %s24_s9 }
   0x4   :  { %v12_v2 = vsel %vm11_vm0, %v10_v1, 0.0  ;;  %s35_s10 = scalar_lea.vmem %s25_s9, 128  ;;  %p40_p1 = scmp.lt.s32.totalorder %s25_s9, %s25_s9 }
   0x5   :  { %13 = vadd.xlane.f32.xlu0 %v12_v2  ;;  %p36_p0 = scmp.ne.s32.totalorder %s25_s9, %s35_s10  ;;  %p41_p2 = scmp.lt.s32.totalorder %s35_s10, %s35_s10 }
   0x7   :  { %p42_p3 = por %p41_p2, %p40_p1 }
   0x9   :  { %p43_p4 = pnand %p42_p3, %p36_p0 }
  0x92   :  { %v14_v3 = vpop.xlane.xlu0 %13 }
  0x93   :  { %33 = vrsqrt.f32 %v14_v3 }
  0x9d   :  { %v34_v4 = vpop.eup %33 }
  0x9e   :  { %v16_v5 = vmul.f32 %v34_v4, %v9_v0 }
  0xa0   :  { %17 = vst.msk [vmem:[#allocation2] sm:$0xff] %vm11_vm0, %v16_v5 }
  0xa1   :  { %46 = shalt.err (!%p43_p4)
}
  0xa2   :  { %s47_s12 = scalar_lea.hbm %s86_s1, 128 }
  0xa3   :  { %p48_p5 = scmp.ne.s32.totalorder %s86_s1, %s47_s12  ;;  %p51_p6 = scmp.lt.u32.totalorder %s47_s12, %s86_s1 }
  0xa5   :  { %p53_p7 = pnand %p51_p6, %p48_p5 }
  0xa7   :  { %56 = shalt.err (!%p53_p7)
}
  0xa8   :  { %27 = dma.vmem_to_hbm [thread:$0]  %s25_s9, 128, %s86_s1, [#allocation3]  }
  0xa9   :  { %57 = dma.done.wait [#allocation3], 128  }
  0xaa   :  { %58 = vsyncadd [#allocation3], 4294967168 }
  0xab   :  { %31 = vsyncpa [#allocation3], 1 }

</bundles_post_ra>
